<compile_context>
chip_gen: v6e
topology: v6e:2x2x1
jax: 0.10.0
libtpu: 0.0.40
codegen_flags: <defaults>
</compile_context>

<pallas_src>
import jax
import jax.numpy as jnp
from jax.experimental import pallas as pl
from jax.experimental.pallas import tpu as pltpu

LANE = 128  # lane-dense padded output width


# ----------------------------- Pallas kernels ------------------------------

def _gcn_fused_kernel(adj_ref, x_ref, w1_ref, b1_ref, w2_ref, b2_ref,
                      w3_ref, b3_ref, w4_ref, b4_ref, o_ref):
    """Whole GCN forward with A_hat and all operands VMEM-resident."""
    f32, bf16 = jnp.float32, jnp.bfloat16
    adj = adj_ref[...]                                             # bf16 [N,N]

    # conv1: H1 = relu(A_hat @ (X @ W1) + b1)      (A(XW) ordering)
    p1 = jnp.dot(x_ref[...], w1_ref[...], preferred_element_type=f32).astype(bf16)
    h1 = jnp.maximum(jnp.dot(adj, p1, preferred_element_type=f32) + b1_ref[...], 0.0)
    # TODO(synk): F.dropout(p=0.5, training=True) between the convs omitted
    # (eval-mode identity only).

    # conv2: H2 = relu(A_hat @ (H1 @ W2) + b2)
    p2 = jnp.dot(h1.astype(bf16), w2_ref[...], preferred_element_type=f32).astype(bf16)
    h2 = jnp.maximum(jnp.dot(adj, p2, preferred_element_type=f32) + b2_ref[...], 0.0)

    # linear1 + relu; linear2 padded to 128 lanes for a lane-dense final store
    h3 = jnp.maximum(
        jnp.dot(h2.astype(bf16), w3_ref[...], preferred_element_type=f32)
        + b3_ref[...], 0.0)
    o_ref[...] = (jnp.dot(h3.astype(bf16), w4_ref[...],
                          preferred_element_type=f32) + b4_ref[...])


def _conv1_tiled_kernel(adj_ref, p1_ref, b1_ref, w2p_ref, o_ref, acc_ref):
    """P2_pad[rows] = relu(A_hat[rows] @ P1 + b1) @ W2_pad   (K-tiled)."""
    k = pl.program_id(1)

    @pl.when(k == 0)
    def _():
        acc_ref[...] = jnp.zeros_like(acc_ref)

    acc_ref[...] += jnp.dot(adj_ref[...], p1_ref[...],
                            preferred_element_type=jnp.float32)

    @pl.when(k == pl.num_programs(1) - 1)
    def _():
        h1 = jnp.maximum(acc_ref[...] + b1_ref[...], 0.0)
        # TODO(synk): dropout(p=0.5) omitted (eval-mode identity only).
        o_ref[...] = jnp.dot(h1.astype(jnp.bfloat16), w2p_ref[...],
                             preferred_element_type=jnp.float32).astype(o_ref.dtype)


def _conv2_head_tiled_kernel(adj_ref, p2_ref, b2p_ref, w3p_ref, b3_ref,
                             w4p_ref, b4p_ref, o_ref, acc_ref):
    """logits_pad[rows] = relu(relu(A@P2 + b2) @ W3 + b3) @ W4_pad + b4_pad."""
    k = pl.program_id(1)

    @pl.when(k == 0)
    def _():
        acc_ref[...] = jnp.zeros_like(acc_ref)

    acc_ref[...] += jnp.dot(adj_ref[...], p2_ref[...],
                            preferred_element_type=jnp.float32)

    @pl.when(k == pl.num_programs(1) - 1)
    def _():
        h2 = jnp.maximum(acc_ref[...] + b2p_ref[...], 0.0)
        h3 = jnp.maximum(
            jnp.dot(h2.astype(jnp.bfloat16), w3p_ref[...],
                    preferred_element_type=jnp.float32) + b3_ref[...], 0.0)
        o_ref[...] = (jnp.dot(h3.astype(jnp.bfloat16), w4p_ref[...],
                              preferred_element_type=jnp.float32) + b4p_ref[...])


# ------------------------------ VMEM budgeting ------------------------------

def _vmem_capacity_bytes():
    """Generation-aware VMEM capacity (128 MiB v5e/v6e, 64 MiB v7x)."""
    try:
        return int(pltpu.get_tpu_info().vmem_capacity_bytes)
    except Exception:
        return 64 * 1024 * 1024   # conservative fallback (v7x per-core VMEM)


def _choose_tiles(n, budget_bytes):
    """Largest (row, K) tiles whose full per-step footprint fits the budget.

    Accounts for: double-buffered bf16 adjacency tile, double-buffered bf16
    K-slab of P (<=128 lanes), double-buffered f32 128-lane output tile,
    f32 accumulator scratch, and a generous weight allowance.
    """
    def fits(tm, tk):
        adj = 2 * tm * tk * 2
        pin = 2 * tk * LANE * 2
        out = 2 * tm * LANE * 4
        acc = tm * LANE * 4
        wts = 256 * 1024
        return adj + pin + out + acc + wts <= budget_bytes

    tm_cands = [t for t in (1024, 512, 256, 128, 64, 32, 16, 8)
                if t <= n and n % t == 0]
    tk_cands = [t for t in (1024, 512, 256, 128) if t <= n and n % t == 0]
    if not tk_cands:
        tk_cands = [n]              # tiny graph: full-K (last dim == full dim)
    for tm in tm_cands:
        for tk in tk_cands:
            if fits(tm, tk):
                return tm, tk
    return (tm_cands[-1] if tm_cands else n), tk_cands[-1]


# --------------------------------- wrapper ----------------------------------

def gcn_forward(adj_hat, x, params, *, row_tile=None, k_tile=None,
                force_tiled=False):
    """Fused GCN forward. adj_hat: [N,N] f32 normalized adjacency, x: [N,22]."""
    n, in_feats = x.shape
    w1, b1, w2, b2, w3, b3, w4, b4 = params
    hidden = w1.shape[1]      # 32
    mid = w2.shape[1]         # 20
    lin_h = w3.shape[1]       # 10
    out_dim = w4.shape[1]     # 2

    bf16 = jnp.bfloat16
    cap = _vmem_capacity_bytes()
    vmem_limit = min(int(cap * 0.75), 100 * 1024 * 1024)

    adj_bf = adj_hat.astype(bf16)               # O(N^2) operand -> bf16
    x_bf = x.astype(bf16)
    w1_bf, w2_bf, w3_bf = w1.astype(bf16), w2.astype(bf16), w3.astype(bf16)

    # Pad the 2-wide logits head to 128 lanes (lane-dense final store).
    w4_pad = jnp.zeros((lin_h, LANE), jnp.float32).at[:, :out_dim].set(w4).astype(bf16)
    b4_pad = jnp.zeros((1, LANE), jnp.float32).at[:, :out_dim].set(b4)

    # ----------------------- fully fused small-N path -----------------------
    fused_bytes = 2 * (n * n * 2 + n * in_feats * 2 + n * LANE * 4) + (1 << 20)
    use_fused = (not force_tiled) and fused_bytes <= int(cap * 0.6)

    if use_fused:
        # Single grid step: A_hat read from HBM once, no intermediate HBM
        # round-trips.  (Single-core on v7x, but at this size the kernel is
        # launch-overhead dominated, so one launch beats core-splitting.)
        full2d = lambda arr: pl.BlockSpec(arr.shape, lambda i: (0, 0))
        logits_pad = pl.pallas_call(
            _gcn_fused_kernel,
            grid=(1,),
            in_specs=[full2d(adj_bf), full2d(x_bf), full2d(w1_bf), full2d(b1),
                      full2d(w2_bf), full2d(b2), full2d(w3_bf), full2d(b3),
                      full2d(w4_pad), full2d(b4_pad)],
            out_specs=pl.BlockSpec((n, LANE), lambda i: (0, 0)),
            out_shape=jax.ShapeDtypeStruct((n, LANE), jnp.float32),
            compiler_params=pltpu.CompilerParams(
                dimension_semantics=("arbitrary",),
                vmem_limit_bytes=vmem_limit),
        )(adj_bf, x_bf, w1_bf, b1, w2_bf, b2, w3_bf, b3, w4_pad, b4_pad)
        return logits_pad[:, :out_dim]

    # ------------------------ large-graph tiled path -------------------------
    tm, tk = _choose_tiles(n, int(cap * 0.5))
    if row_tile is not None:
        tm = row_tile
    if k_tile is not None:
        tk = k_tile
    if n % tm != 0 or n % tk != 0:
        raise ValueError(f"tiles ({tm},{tk}) must divide num_nodes {n}")
    grid = (n // tm, n // tk)

    cparams = pltpu.CompilerParams(
        dimension_semantics=("parallel", "arbitrary"),
        vmem_limit_bytes=vmem_limit)

    # Stage 1 (tiny N x 22 x 32 node-local projection) left to plain XLA.
    p1 = jnp.dot(x_bf, w1_bf, preferred_element_type=jnp.float32).astype(bf16)

    # Lane-pad stage-2 output (mid=20 -> 128) so its store is lane-dense.
    w2_pad = jnp.zeros((hidden, LANE), jnp.float32).at[:, :mid].set(w2).astype(bf16)
    b2_pad = jnp.zeros((1, LANE), jnp.float32).at[:, :mid].set(b2)
    w3_pad = jnp.zeros((LANE, lin_h), jnp.float32).at[:mid, :].set(w3).astype(bf16)

    adj_spec = pl.BlockSpec((tm, tk), lambda i, k: (i, k))
    fixed = lambda arr: pl.BlockSpec(arr.shape, lambda i, k: (0, 0))
    out_spec = pl.BlockSpec((tm, LANE), lambda i, k: (i, 0))

    # Stage 2: P2_pad = relu(A_hat @ P1 + b1) @ W2_pad              [N,128] bf16
    p2_pad = pl.pallas_call(
        _conv1_tiled_kernel,
        grid=grid,
        in_specs=[adj_spec,
                  pl.BlockSpec((tk, hidden), lambda i, k: (k, 0)),
                  fixed(b1), fixed(w2_pad)],
        out_specs=out_spec,
        out_shape=jax.ShapeDtypeStruct((n, LANE), bf16),
        scratch_shapes=[pltpu.VMEM((tm, hidden), jnp.float32)],
        compiler_params=cparams,
    )(adj_bf, p1, b1, w2_pad)

    # Stage 3: logits_pad = relu(relu(A@P2 + b2) @ W3 + b3) @ W4_pad + b4_pad
    logits_pad = pl.pallas_call(
        _conv2_head_tiled_kernel,
        grid=grid,
        in_specs=[adj_spec,
                  pl.BlockSpec((tk, LANE), lambda i, k: (k, 0)),
                  fixed(b2_pad), fixed(w3_pad), fixed(b3),
                  fixed(w4_pad), fixed(b4_pad)],
        out_specs=out_spec,
        out_shape=jax.ShapeDtypeStruct((n, LANE), jnp.float32),
        scratch_shapes=[pltpu.VMEM((tm, LANE), jnp.float32)],
        compiler_params=cparams,
    )(adj_bf, p2_pad, b2_pad, w3_pad, b3, w4_pad, b4_pad)

    return logits_pad[:, :out_dim]


# ------------------------------- JAX glue -----------------------------------

def build_normalized_adjacency(edge_index, num_nodes):
    """Dense A_hat = D^-1/2 (A + I) D^-1/2 matching PyG GCNConv's gcn_norm."""
    src, dst = edge_index[0], edge_index[1]
    a = jnp.zeros((num_nodes, num_nodes), jnp.float32)
    a = a.at[dst, src].add(1.0)                      # message j -> i in row i
    a = a + jnp.eye(num_nodes, dtype=jnp.float32)    # self-loops
    deg = a.sum(axis=1)
    d_inv_sqrt = jnp.where(deg > 0, 1.0 / jnp.sqrt(deg), 0.0)
    return d_inv_sqrt[:, None] * a * d_inv_sqrt[None, :]


def init_params(key, hidden_channels=32):
    """Deterministic synthetic params with the module's shapes.
    GCNConv(22, H), GCNConv(H, 20), Linear(20, 10), Linear(10, 2).
    Weights stored [in, out]; biases [1, out]."""
    ks = jax.random.split(key, 8)

    def glorot(k, fan_in, fan_out):
        lim = jnp.sqrt(6.0 / (fan_in + fan_out))
        return jax.random.uniform(k, (fan_in, fan_out), jnp.float32, -lim, lim)

    w1 = glorot(ks[0], 22, hidden_channels)
    b1 = jnp.zeros((1, hidden_channels), jnp.float32)
    w2 = glorot(ks[1], hidden_channels, 20)
    b2 = jnp.zeros((1, 20), jnp.float32)
    lim3 = 1.0 / jnp.sqrt(20.0)
    w3 = jax.random.uniform(ks[2], (20, 10), jnp.float32, -lim3, lim3)
    b3 = jax.random.uniform(ks[3], (1, 10), jnp.float32, -lim3, lim3)
    lim4 = 1.0 / jnp.sqrt(10.0)
    w4 = jax.random.uniform(ks[4], (10, 2), jnp.float32, -lim4, lim4)
    b4 = jax.random.uniform(ks[5], (1, 2), jnp.float32, -lim4, lim4)
    return (w1, b1, w2, b2, w3, b3, w4, b4)


def _reference(adj_hat, x, params):
    """Pure-JAX reference with the same bf16-inputs / f32-accumulate recipe."""
    bf = lambda a: a.astype(jnp.bfloat16)
    w1, b1, w2, b2, w3, b3, w4, b4 = params
    adj = bf(adj_hat)
    p1 = jnp.dot(bf(x), bf(w1), preferred_element_type=jnp.float32).astype(jnp.bfloat16)
    h1 = jnp.maximum(jnp.dot(adj, p1, preferred_element_type=jnp.float32) + b1, 0.0)
    p2 = jnp.dot(bf(h1), bf(w2), preferred_element_type=jnp.float32).astype(jnp.bfloat16)
    h2 = jnp.maximum(jnp.dot(adj, p2, preferred_element_type=jnp.float32) + b2, 0.0)
    h3 = jnp.maximum(
        jnp.dot(bf(h2), bf(w3), preferred_element_type=jnp.float32) + b3, 0.0)
    return jnp.dot(bf(h3), bf(w4), preferred_element_type=jnp.float32) + b4


# --------------------------------- main --------------------------------------

if __name__ == "__main__":
    key = jax.random.PRNGKey(0)
    k_x, k_p = jax.random.split(key)

    num_nodes = 256
    in_feats = 22

    # Node features [N, 22]
    x = jax.random.normal(k_x, (num_nodes, in_feats), jnp.float32)

    # Deterministic bidirectional ring graph: edge_index [2, 2N]
    idx = jnp.arange(num_nodes, dtype=jnp.int32)
    src = jnp.concatenate([idx, (idx + 1) % num_nodes])
    dst = jnp.concatenate([(idx + 1) % num_nodes, idx])
    edge_index = jnp.stack([src, dst], axis=0)

    adj_hat = build_normalized_adjacency(edge_index, num_nodes)
    params = init_params(k_p, hidden_channels=32)
    ref = _reference(adj_hat, x, params)

    # Fused single-call path (whole problem VMEM-resident at N=256).
    out = gcn_forward(adj_hat, x, params)
    jax.block_until_ready(out)
    assert out.shape == (num_nodes, 2)
    assert jnp.allclose(out, ref, atol=1e-2, rtol=1e-2), float(
        jnp.max(jnp.abs(out - ref)))

    # Also exercise the large-graph row+K-tiled fallback on the same inputs
    # (grid = (4 row tiles, 2 K tiles) per aggregation stage).
    out_tiled = gcn_forward(adj_hat, x, params, force_tiled=True,
                            row_tile=64, k_tile=128)
    jax.block_until_ready(out_tiled)
    assert out_tiled.shape == (num_nodes, 2)
    assert jnp.allclose(out_tiled, ref, atol=1e-2, rtol=1e-2), float(
        jnp.max(jnp.abs(out_tiled - ref)))

    print("KERNEL_OK")
</pallas_src>

<mosaic_0001>
module attributes {stable_mosaic.version = 11 : i64} {
  func.func @_gcn_fused_kernel(%arg0: i32, %arg1: memref<256x256xbf16, #tpu.memory_space<vmem>>, %arg2: memref<256x22xbf16, #tpu.memory_space<vmem>>, %arg3: memref<22x32xbf16, #tpu.memory_space<vmem>>, %arg4: memref<1x32xf32, #tpu.memory_space<vmem>>, %arg5: memref<32x20xbf16, #tpu.memory_space<vmem>>, %arg6: memref<1x20xf32, #tpu.memory_space<vmem>>, %arg7: memref<20x10xbf16, #tpu.memory_space<vmem>>, %arg8: memref<1x10xf32, #tpu.memory_space<vmem>>, %arg9: memref<10x128xbf16, #tpu.memory_space<vmem>>, %arg10: memref<1x128xf32, #tpu.memory_space<vmem>>, %arg11: memref<256x128xf32, #tpu.memory_space<vmem>>) attributes {dimension_semantics = [#tpu.dimension_semantics<arbitrary>], iteration_bounds = array<i64: 1>, scalar_prefetch = 0 : i64, scratch_operands = 0 : i64, tpu.core_type = #tpu.core_type<tc>, window_params = [{pipeline_mode = #tpu.pipeline_mode<synchronous>, transform_indices = @transform_0, window_bounds = array<i64: 256, 256>}, {pipeline_mode = #tpu.pipeline_mode<synchronous>, transform_indices = @transform_1, window_bounds = array<i64: 256, 22>}, {pipeline_mode = #tpu.pipeline_mode<synchronous>, transform_indices = @transform_2, window_bounds = array<i64: 22, 32>}, {pipeline_mode = #tpu.pipeline_mode<synchronous>, transform_indices = @transform_3, window_bounds = array<i64: 1, 32>}, {pipeline_mode = #tpu.pipeline_mode<synchronous>, transform_indices = @transform_4, window_bounds = array<i64: 32, 20>}, {pipeline_mode = #tpu.pipeline_mode<synchronous>, transform_indices = @transform_5, window_bounds = array<i64: 1, 20>}, {pipeline_mode = #tpu.pipeline_mode<synchronous>, transform_indices = @transform_6, window_bounds = array<i64: 20, 10>}, {pipeline_mode = #tpu.pipeline_mode<synchronous>, transform_indices = @transform_7, window_bounds = array<i64: 1, 10>}, {pipeline_mode = #tpu.pipeline_mode<synchronous>, transform_indices = @transform_8, window_bounds = array<i64: 10, 128>}, {pipeline_mode = #tpu.pipeline_mode<synchronous>, transform_indices = @transform_9, window_bounds = array<i64: 1, 128>}, {pipeline_mode = #tpu.pipeline_mode<synchronous>, transform_indices = @transform_10, window_bounds = array<i64: 256, 128>}]} {
    %c0 = arith.constant 0 : index
    %c0_0 = arith.constant 0 : index
    %0 = vector.load %arg1[%c0, %c0_0] : memref<256x256xbf16, #tpu.memory_space<vmem>>, vector<256x256xbf16>
    %c0_1 = arith.constant 0 : index
    %c0_2 = arith.constant 0 : index
    %1 = vector.load %arg2[%c0_1, %c0_2] : memref<256x22xbf16, #tpu.memory_space<vmem>>, vector<256x22xbf16>
    %c0_3 = arith.constant 0 : index
    %c0_4 = arith.constant 0 : index
    %2 = vector.load %arg3[%c0_3, %c0_4] : memref<22x32xbf16, #tpu.memory_space<vmem>>, vector<22x32xbf16>
    %cst = arith.constant dense<0.000000e+00> : vector<256x32xf32>
    %3 = tpu.matmul %1, %2, %cst {dimension_numbers = #tpu.dot_dimension_numbers<[1], [0], [0], [1], [0, 0, 1, 1], [], []>} : vector<256x22xbf16>, vector<22x32xbf16>, vector<256x32xf32> -> vector<256x32xf32>
    %4 = arith.truncf %3 : vector<256x32xf32> to vector<256x32xbf16>
    %cst_5 = arith.constant dense<0.000000e+00> : vector<256x32xf32>
    %5 = tpu.matmul %0, %4, %cst_5 {dimension_numbers = #tpu.dot_dimension_numbers<[1], [0], [0], [1], [0, 0, 1, 1], [], []>} : vector<256x256xbf16>, vector<256x32xbf16>, vector<256x32xf32> -> vector<256x32xf32>
    %c0_6 = arith.constant 0 : index
    %c0_7 = arith.constant 0 : index
    %6 = vector.load %arg4[%c0_6, %c0_7] : memref<1x32xf32, #tpu.memory_space<vmem>>, vector<1x32xf32>
    %7 = vector.broadcast %6 : vector<1x32xf32> to vector<256x32xf32>
    %8 = arith.addf %5, %7 : vector<256x32xf32>
    %cst_8 = arith.constant 0.000000e+00 : f32
    %9 = vector.broadcast %cst_8 : f32 to vector<256x32xf32>
    %10 = arith.maximumf %8, %9 : vector<256x32xf32>
    %11 = arith.truncf %10 : vector<256x32xf32> to vector<256x32xbf16>
    %c0_9 = arith.constant 0 : index
    %c0_10 = arith.constant 0 : index
    %12 = vector.load %arg5[%c0_9, %c0_10] : memref<32x20xbf16, #tpu.memory_space<vmem>>, vector<32x20xbf16>
    %cst_11 = arith.constant dense<0.000000e+00> : vector<256x20xf32>
    %13 = tpu.matmul %11, %12, %cst_11 {dimension_numbers = #tpu.dot_dimension_numbers<[1], [0], [0], [1], [0, 0, 1, 1], [], []>} : vector<256x32xbf16>, vector<32x20xbf16>, vector<256x20xf32> -> vector<256x20xf32>
    %14 = arith.truncf %13 : vector<256x20xf32> to vector<256x20xbf16>
    %cst_12 = arith.constant dense<0.000000e+00> : vector<256x20xf32>
    %15 = tpu.matmul %0, %14, %cst_12 {dimension_numbers = #tpu.dot_dimension_numbers<[1], [0], [0], [1], [0, 0, 1, 1], [], []>} : vector<256x256xbf16>, vector<256x20xbf16>, vector<256x20xf32> -> vector<256x20xf32>
    %c0_13 = arith.constant 0 : index
    %c0_14 = arith.constant 0 : index
    %16 = vector.load %arg6[%c0_13, %c0_14] : memref<1x20xf32, #tpu.memory_space<vmem>>, vector<1x20xf32>
    %17 = vector.broadcast %16 : vector<1x20xf32> to vector<256x20xf32>
    %18 = arith.addf %15, %17 : vector<256x20xf32>
    %cst_15 = arith.constant 0.000000e+00 : f32
    %19 = vector.broadcast %cst_15 : f32 to vector<256x20xf32>
    %20 = arith.maximumf %18, %19 : vector<256x20xf32>
    %21 = arith.truncf %20 : vector<256x20xf32> to vector<256x20xbf16>
    %c0_16 = arith.constant 0 : index
    %c0_17 = arith.constant 0 : index
    %22 = vector.load %arg7[%c0_16, %c0_17] : memref<20x10xbf16, #tpu.memory_space<vmem>>, vector<20x10xbf16>
    %cst_18 = arith.constant dense<0.000000e+00> : vector<256x10xf32>
    %23 = tpu.matmul %21, %22, %cst_18 {dimension_numbers = #tpu.dot_dimension_numbers<[1], [0], [0], [1], [0, 0, 1, 1], [], []>} : vector<256x20xbf16>, vector<20x10xbf16>, vector<256x10xf32> -> vector<256x10xf32>
    %c0_19 = arith.constant 0 : index
    %c0_20 = arith.constant 0 : index
    %24 = vector.load %arg8[%c0_19, %c0_20] : memref<1x10xf32, #tpu.memory_space<vmem>>, vector<1x10xf32>
    %25 = vector.broadcast %24 : vector<1x10xf32> to vector<256x10xf32>
    %26 = arith.addf %23, %25 : vector<256x10xf32>
    %cst_21 = arith.constant 0.000000e+00 : f32
    %27 = vector.broadcast %cst_21 : f32 to vector<256x10xf32>
    %28 = arith.maximumf %26, %27 : vector<256x10xf32>
    %29 = arith.truncf %28 : vector<256x10xf32> to vector<256x10xbf16>
    %c0_22 = arith.constant 0 : index
    %c0_23 = arith.constant 0 : index
    %30 = vector.load %arg9[%c0_22, %c0_23] : memref<10x128xbf16, #tpu.memory_space<vmem>>, vector<10x128xbf16>
    %cst_24 = arith.constant dense<0.000000e+00> : vector<256x128xf32>
    %31 = tpu.matmul %29, %30, %cst_24 {dimension_numbers = #tpu.dot_dimension_numbers<[1], [0], [0], [1], [0, 0, 1, 1], [], []>} : vector<256x10xbf16>, vector<10x128xbf16>, vector<256x128xf32> -> vector<256x128xf32>
    %c0_25 = arith.constant 0 : index
    %c0_26 = arith.constant 0 : index
    %32 = vector.load %arg10[%c0_25, %c0_26] : memref<1x128xf32, #tpu.memory_space<vmem>>, vector<1x128xf32>
    %33 = vector.broadcast %32 : vector<1x128xf32> to vector<256x128xf32>
    %34 = arith.addf %31, %33 : vector<256x128xf32>
    %c0_27 = arith.constant 0 : index
    %c0_28 = arith.constant 0 : index
    %35 = vector.load %arg11[%c0_27, %c0_28] : memref<256x128xf32, #tpu.memory_space<vmem>>, vector<256x128xf32>
    tpu.vector_store %arg11[%c0_27, %c0_28], %34 {strides = array<i32>} : memref<256x128xf32, #tpu.memory_space<vmem>>, vector<256x128xf32>,
    return
  }
  func.func @transform_0(%arg0: i32) -> (i32, i32) {
    %c0_i32 = arith.constant 0 : i32
    %c0_i32_0 = arith.constant 0 : i32
    %c0_i32_1 = arith.constant 0 : i32
    return %c0_i32, %c0_i32_0 : i32, i32
  }
  func.func @transform_1(%arg0: i32) -> (i32, i32) {
    %c0_i32 = arith.constant 0 : i32
    %c0_i32_0 = arith.constant 0 : i32
    %c0_i32_1 = arith.constant 0 : i32
    return %c0_i32, %c0_i32_0 : i32, i32
  }
  func.func @transform_2(%arg0: i32) -> (i32, i32) {
    %c0_i32 = arith.constant 0 : i32
    %c0_i32_0 = arith.constant 0 : i32
    %c0_i32_1 = arith.constant 0 : i32
    return %c0_i32, %c0_i32_0 : i32, i32
  }
  func.func @transform_3(%arg0: i32) -> (i32, i32) {
    %c0_i32 = arith.constant 0 : i32
    %c0_i32_0 = arith.constant 0 : i32
    %c0_i32_1 = arith.constant 0 : i32
    return %c0_i32, %c0_i32_0 : i32, i32
  }
  func.func @transform_4(%arg0: i32) -> (i32, i32) {
    %c0_i32 = arith.constant 0 : i32
    %c0_i32_0 = arith.constant 0 : i32
    %c0_i32_1 = arith.constant 0 : i32
    return %c0_i32, %c0_i32_0 : i32, i32
  }
  func.func @transform_5(%arg0: i32) -> (i32, i32) {
    %c0_i32 = arith.constant 0 : i32
    %c0_i32_0 = arith.constant 0 : i32
    %c0_i32_1 = arith.constant 0 : i32
    return %c0_i32, %c0_i32_0 : i32, i32
  }
  func.func @transform_6(%arg0: i32) -> (i32, i32) {
    %c0_i32 = arith.constant 0 : i32
    %c0_i32_0 = arith.constant 0 : i32
    %c0_i32_1 = arith.constant 0 : i32
    return %c0_i32, %c0_i32_0 : i32, i32
  }
  func.func @transform_7(%arg0: i32) -> (i32, i32) {
    %c0_i32 = arith.constant 0 : i32
    %c0_i32_0 = arith.constant 0 : i32
    %c0_i32_1 = arith.constant 0 : i32
    return %c0_i32, %c0_i32_0 : i32, i32
  }
  func.func @transform_8(%arg0: i32) -> (i32, i32) {
    %c0_i32 = arith.constant 0 : i32
    %c0_i32_0 = arith.constant 0 : i32
    %c0_i32_1 = arith.constant 0 : i32
    return %c0_i32, %c0_i32_0 : i32, i32
  }
  func.func @transform_9(%arg0: i32) -> (i32, i32) {
    %c0_i32 = arith.constant 0 : i32
    %c0_i32_0 = arith.constant 0 : i32
    %c0_i32_1 = arith.constant 0 : i32
    return %c0_i32, %c0_i32_0 : i32, i32
  }
  func.func @transform_10(%arg0: i32) -> (i32, i32) {
    %c0_i32 = arith.constant 0 : i32
    %c0_i32_0 = arith.constant 0 : i32
    %c0_i32_1 = arith.constant 0 : i32
    return %c0_i32, %c0_i32_0 : i32, i32
  }
}

</mosaic_0001>

<bundles_post_ra>
// kernel: tpu_custom_call.1
= control target key start
LH: loop header
LB: loop body
LE: loop exit
PB: predicated region body
PF: predicated region fallthrough
CT: control target
= control target key end

     0   :  { %15 = vsyncpa [#allocation3], 0  ;;  %s3026_s0 = inlined_call_operand.hbm [shape: bf16[256,256], index: 0, kind: input, shape index: {}]   ;;  %s3027_s1 = inlined_call_operand.vmem [shape: bf16[256,22], index: 1, kind: input, shape index: {}]   ;;  %s3028_s2 = inlined_call_operand.vmem [shape: bf16[22,32], index: 2, kind: input, shape index: {}]   ;;  %s3029_s3 = inlined_call_operand.vmem [shape: f32[1,32], index: 3, kind: input, shape index: {}]   ;;  %s3030_s4 = inlined_call_operand.vmem [shape: bf16[32,20], index: 4, kind: input, shape index: {}]   ;;  %s3031_s5 = inlined_call_operand.vmem [shape: f32[1,20], index: 5, kind: input, shape index: {}]   ;;  %s3032_s6 = inlined_call_operand.vmem [shape: bf16[20,10], index: 6, kind: input, shape index: {}]   ;;  %s3033_s7 = inlined_call_operand.vmem [shape: f32[1,10], index: 7, kind: input, shape index: {}]   ;;  %s3034_s8 = inlined_call_operand.vmem [shape: bf16[10,128], index: 8, kind: input, shape index: {}]   ;;  %s3035_s9 = inlined_call_operand.vmem [shape: f32[1,128], index: 9, kind: input, shape index: {}]   ;;  %s3036_s10 = inlined_call_operand.hbm [shape: f32[256,128], index: 10, kind: output, shape index: {}]  }
   0x1   :  { %16 = vsyncpa [#allocation4], 0  ;;  %s2527_s13 = smov [#allocation2]  }
   0x2   :  { %s22_s14 = sshll.u32 %s2527_s13, 4  ;;  %s23_s14 = int_to_ptr.vmem [resolvable:$true] %s22_s14 }
   0x3   :  { %s2491_s15 = scalar_lea.vmem %s23_s14, 4096  ;;  %p2496_p1 = scmp.lt.s32.totalorder %s23_s14, %s23_s14 }
   0x4   :  { %p2492_p0 = scmp.ne.s32.totalorder %s23_s14, %s2491_s15  ;;  %p2497_p2 = scmp.lt.s32.totalorder %s2491_s15, %s2491_s15 }
   0x6   :  { %p2498_p3 = por %p2497_p2, %p2496_p1 }
   0x8   :  { %p2499_p4 = pnand %p2498_p3, %p2492_p0 }
   0xa   :  { %2502 = shalt.err (!%p2499_p4)
}
   0xb   :  { %s2528_s16 = smov 128   ;;  %s2529_s17 = smov 8  }
   0xc   :  { %28 = dma.hbm_to_vmem [thread:$0]  %s3026_s0, 4096, %s23_s14, [#allocation3], %s2528_s16, %s2528_s16, %s2529_s17  }
   0xd   :  { %2523 = dma.done.wait [#allocation3], 4096  }
   0xe   :  { %2524 = vsyncadd [#allocation3], 4294963200  ;;  %vm256_vm0 = vcmask 1042432   ;;  %vm207_vm1 = vcmask 179200   ;;  %v2413_v1 = vld [vmem:[%s3028_s2] sm:$0xff]   ;;  %v2415_v4 = vld [vmem:[%s3027_s1 + $0x8] sm:$0xff]  }
   0xf   :  { %v2412_v0 = vld [vmem:[%s3028_s2 + $0x8] ss:$0 sps:$4 sm:$0x77]   ;;  %v2414_v3 = vld [vmem:[%s3027_s1] sm:$0xff]   ;;  %v2416_v5 = vld [vmem:[%s3027_s1 + $0x10] sm:$0xff]   ;;  %vm829_vm2 = vcmask 261120  }
  0x10   :  { %2405 = vmatprep.subr.msk.bf16.mxu0 %vm256_vm0, %v2412_v0  ;;  %v258_v2 = vsel %vm256_vm0, %v2412_v0, 0  ;;  %2251 = vmatprep.mubr.msk.bf16.mxu0 %vm207_vm1, %v2414_v3  ;;  %v2417_v6 = vld [vmem:[%s3027_s1 + $0x18] sm:$0xff]   ;;  %v2418_v7 = vld [vmem:[%s3027_s1 + $0x20] sm:$0xff]   ;;  %v2419_v8 = vld [vmem:[%s3027_s1 + $0x28] sm:$0xff]   ;;  %vm1339_vm3 = vcmask 1041408   ;;  %vm1290_vm4 = vcmask 162816  }
  0x11   :  { %2248 = vmatpush3.bf16.msra.mxu0 %v258_v2  ;;  %v2420_v9 = vld [vmem:[%s3027_s1 + $0x30] sm:$0xff]   ;;  %v2421_v10 = vld [vmem:[%s3027_s1 + $0x38] sm:$0xff]   ;;  %v2422_v11 = vld [vmem:[%s3027_s1 + $0x40] sm:$0xff]   ;;  %vm1615_vm5 = vcmask 1044480   ;;  %vm1566_vm6 = vcmask 80896  }
  0x12   :  { %2249 = vmatprep.subr.bf16.mxu0 %v2413_v1  ;;  %v2423_v12 = vld [vmem:[%s3027_s1 + $0x48] sm:$0xff]   ;;  %v2424_v13 = vld [vmem:[%s3027_s1 + $0x50] sm:$0xff]   ;;  %v2425_v14 = vld [vmem:[%s3027_s1 + $0x58] sm:$0xff]  }
  0x13   :  { %v2426_v15 = vld [vmem:[%s3027_s1 + $0x60] sm:$0xff]   ;;  %v2427_v16 = vld [vmem:[%s3027_s1 + $0x68] sm:$0xff]   ;;  %v2428_v17 = vld [vmem:[%s3027_s1 + $0x70] sm:$0xff]  }
  0x14   :  { %v2429_v18 = vld [vmem:[%s3027_s1 + $0x78] sm:$0xff]   ;;  %v2662_v19 = vld [vmem:[#allocation2 + $0x4] ss:$8 sps:$4 sm:$0xff]  }
  0x15   :  { %2250 = vmatpush3.bf16.msra.mxu0 %v2413_v1  ;;  %v2664_v20 = vld [vmem:[#allocation2 + $0x14] ss:$8 sps:$4 sm:$0xff]  }
  0x16   :  { %644 = vmatprep.mubr.bf16.mxu1 %v2664_v20 }
  0x18   :  { %2252 = vmatmul.mubr.msk.bf16.vlgmr.msra.gmra.mxu0 %vm207_vm1, %v2415_v4 }
  0x19   :  { %2255 = vmatprep.mubr.msk.bf16.mxu0 %vm207_vm1, %v2416_v5  ;;  %v2678_v5 = vld [vmem:[#allocation2] ss:$8 sps:$4 sm:$0xff]  }
  0x20   :  { %2256 = vmatmul.mubr.msk.bf16.gmra.mxu0 %vm207_vm1, %v2417_v6  ;;  %v2680_v6 = vld [vmem:[#allocation2 + $0x10] ss:$8 sps:$4 sm:$0xff]  }
  0x21   :  { %2259 = vmatprep.mubr.msk.bf16.mxu0 %vm207_vm1, %v2418_v7  ;;  %v2682_v7 = vld [vmem:[#allocation2 + $0x24] ss:$8 sps:$4 sm:$0xff]  }
  0x28   :  { %2260 = vmatmul.mubr.msk.bf16.gmra.mxu0 %vm207_vm1, %v2419_v8  ;;  %v2687_v8 = vld [vmem:[#allocation2 + $0x20] ss:$8 sps:$4 sm:$0xff]  }
  0x29   :  { %2263 = vmatprep.mubr.msk.bf16.mxu0 %vm207_vm1, %v2420_v9  ;;  %v2689_v9 = vld [vmem:[#allocation2 + $0x34] ss:$8 sps:$4 sm:$0xff]  }
  0x30   :  { %2264 = vmatmul.mubr.msk.bf16.gmra.mxu0 %vm207_vm1, %v2421_v10  ;;  %v2693_v10 = vld [vmem:[#allocation2 + $0x30] ss:$8 sps:$4 sm:$0xff]  }
  0x31   :  { %2267 = vmatprep.mubr.msk.bf16.mxu0 %vm207_vm1, %v2422_v11  ;;  %v2695_v11 = vld [vmem:[#allocation2 + $0x44] ss:$8 sps:$4 sm:$0xff]  }
  0x38   :  { %2268 = vmatmul.mubr.msk.bf16.gmra.mxu0 %vm207_vm1, %v2423_v12  ;;  %v2699_v12 = vld [vmem:[#allocation2 + $0x40] ss:$8 sps:$4 sm:$0xff]  }
  0x39   :  { %2271 = vmatprep.mubr.msk.bf16.mxu0 %vm207_vm1, %v2424_v13  ;;  %v2701_v13 = vld [vmem:[#allocation2 + $0x54] ss:$8 sps:$4 sm:$0xff]  }
  0x40   :  { %2272 = vmatmul.mubr.msk.bf16.gmra.mxu0 %vm207_vm1, %v2425_v14  ;;  %v2705_v14 = vld [vmem:[#allocation2 + $0x50] ss:$8 sps:$4 sm:$0xff]  }
  0x41   :  { %2275 = vmatprep.mubr.msk.bf16.mxu0 %vm207_vm1, %v2426_v15  ;;  %v2707_v15 = vld [vmem:[#allocation2 + $0x64] ss:$8 sps:$4 sm:$0xff]  }
  0x48   :  { %2276 = vmatmul.mubr.msk.bf16.gmra.mxu0 %vm207_vm1, %v2427_v16  ;;  %v2711_v16 = vld [vmem:[#allocation2 + $0x60] ss:$8 sps:$4 sm:$0xff]  }
  0x49   :  { %2279 = vmatprep.mubr.msk.bf16.mxu0 %vm207_vm1, %v2428_v17  ;;  %v2713_v17 = vld [vmem:[#allocation2 + $0x74] ss:$8 sps:$4 sm:$0xff]  }
  0x50   :  { %2280 = vmatmul.mubr.msk.bf16.gmra.mxu0 %vm207_vm1, %v2429_v18  ;;  %v2717_v18 = vld [vmem:[#allocation2 + $0x70] ss:$8 sps:$4 sm:$0xff]  }
  0x51   :  { %636 = vmatprep.mubr.bf16.mxu0 %v2662_v19 }
  0xd8   :  { %v2253_v21 = vpop.f32.mrf.mxu0 }
  0xda   :  { %v2668_v22 = vpop.f32.mrf.mxu0 }
  0xdc   :  { %v2254_v23 = vpop.f32.mrf.mxu0 }
  0xdd   :  { %v2670_v24 = vpack.c.bf16 %v2254_v23, %v2253_v21  ;;  %v2719_v21 = vld [vmem:[#allocation2 + $0x84] ss:$8 sps:$4 sm:$0xff]   ;;  %v2725_v23 = vld [vmem:[#allocation2 + $0x94] ss:$8 sps:$4 sm:$0xff]  }
  0xde   :  { %v2672_v25 = vpop.f32.mrf.mxu0 }
  0xdf   :  { %v421_v4 = vpack.c.bf16 %v2672_v25, %v2668_v22  ;;  %v2723_v22 = vld [vmem:[#allocation2 + $0x80] ss:$8 sps:$4 sm:$0xff]   ;;  %v2731_v25 = vld [vmem:[#allocation2 + $0xa4] ss:$8 sps:$4 sm:$0xff]  }
  0xe0   :  { %v2257_v26 = vpop.f32.mrf.mxu0 }
  0xe2   :  { %v310_v27 = vpop.f32.mrf.mxu0 }
  0xe4   :  { %v2258_v28 = vpop.f32.mrf.mxu0 }
  0xe5   :  { %v424_v29 = vpack.c.bf16 %v2258_v28, %v2257_v26  ;;  %v2735_v26 = vld [vmem:[#allocation2 + $0xa0] ss:$8 sps:$4 sm:$0xff]  }
  0xe6   :  { %v313_v30 = vpop.f32.mrf.mxu0  ;;  %v2478_v28 = vld [vmem:[%s3030_s4 + $0x8] sm:$0xff]  }
  0xe7   :  { %v423_v1 = vpack.c.bf16 %v313_v30, %v310_v27  ;;  %v2737_v27 = vld [vmem:[#allocation2 + $0xb4] ss:$8 sps:$4 sm:$0xff]   ;;  %v2747_v30 = vld [vmem:[#allocation2 + $0xb0] ss:$8 sps:$4 sm:$0xff]  }
  0xe8   :  { %v2261_v31 = vpop.f32.mrf.mxu0 }
  0xea   :  { %v326_v32 = vpop.f32.mrf.mxu0 }
  0xec   :  { %v2262_v33 = vpop.f32.mrf.mxu0 }
  0xed   :  { %v426_v60 = vpack.c.bf16 %v2262_v33, %v2261_v31  ;;  %v2749_v31 = vld [vmem:[#allocation2 + $0xc4] ss:$8 sps:$4 sm:$0xff]   ;;  %v2755_v33 = vld [vmem:[#allocation2 + $0xd4] ss:$8 sps:$4 sm:$0xff]  }
  0xee   :  { %v329_v34 = vpop.f32.mrf.mxu0 }
  0xef   :  { %v425_v62 = vpack.c.bf16 %v329_v34, %v326_v32  ;;  %v2753_v32 = vld [vmem:[#allocation2 + $0xc0] ss:$8 sps:$4 sm:$0xff]   ;;  %v2759_v34 = vld [vmem:[#allocation2 + $0xd0] ss:$8 sps:$4 sm:$0xff]  }
  0xf0   :  { %v2265_v35 = vpop.f32.mrf.mxu0  ;;  %3042 = vst [vmem:[#allocation8_spill] sm:$0xff] %v2759_v34 }
  0xf2   :  { %v342_v36 = vpop.f32.mrf.mxu0 }
  0xf4   :  { %v2266_v37 = vpop.f32.mrf.mxu0 }
  0xf5   :  { %v428_v55 = vpack.c.bf16 %v2266_v37, %v2265_v35  ;;  %v2761_v35 = vld [vmem:[#allocation2 + $0xe4] ss:$8 sps:$4 sm:$0xff]   ;;  %v2767_v37 = vld [vmem:[#allocation2 + $0xf4] ss:$8 sps:$4 sm:$0xff]  }
  0xf6   :  { %v345_v38 = vpop.f32.mrf.mxu0  ;;  %3043 = vst [vmem:[#allocation9_spill] sm:$0xff] %v2761_v35  ;;  %3045 = vst [vmem:[#allocation11_spill] sm:$0xff] %v2767_v37 }
  0xf7   :  { %v427_v58 = vpack.c.bf16 %v345_v38, %v342_v36  ;;  %v2765_v36 = vld [vmem:[#allocation2 + $0xe0] ss:$8 sps:$4 sm:$0xff]   ;;  %v2771_v38 = vld [vmem:[#allocation2 + $0xf0] ss:$8 sps:$4 sm:$0xff]  }
  0xf8   :  { %v2269_v39 = vpop.f32.mrf.mxu0  ;;  %3044 = vst [vmem:[#allocation10_spill] sm:$0xff] %v2765_v36  ;;  %3046 = vst [vmem:[#allocation12_spill] sm:$0xff] %v2771_v38 }
  0xfa   :  { %v358_v40 = vpop.f32.mrf.mxu0 }
  0xfc   :  { %v2270_v41 = vpop.f32.mrf.mxu0 }
  0xfd   :  { %v430_v2 = vpack.c.bf16 %v2270_v41, %v2269_v39 }
  0xfe   :  { %v361_v42 = vpop.f32.mrf.mxu0 }
  0xff   :  { %v429_v3 = vpack.c.bf16 %v361_v42, %v358_v40 }
 0x100   :  { %v2273_v43 = vpop.f32.mrf.mxu0 }
 0x102   :  { %v374_v44 = vpop.f32.mrf.mxu0 }
 0x104   :  { %v2274_v45 = vpop.f32.mrf.mxu0 }
 0x105   :  { %v432_v63 = vpack.c.bf16 %v2274_v45, %v2273_v43  ;;  %v2777_v45 = vld [vmem:[%s3029_s3] ss:$0 sm:$0xff] }
 0x106   :  { %v377_v46 = vpop.f32.mrf.mxu0 }
 0x107   :  { %v431_v0 = vpack.c.bf16 %v377_v46, %v374_v44 }
 0x108   :  { %v2277_v47 = vpop.f32.mrf.mxu0 }
 0x10a   :  { %v390_v48 = vpop.f32.mrf.mxu0 }
 0x10c   :  { %v2278_v49 = vpop.f32.mrf.mxu0 }
 0x10d   :  { %v434_v59 = vpack.c.bf16 %v2278_v49, %v2277_v47 }
 0x10e   :  { %v393_v50 = vpop.f32.mrf.mxu0 }
 0x10f   :  { %v433_v61 = vpack.c.bf16 %v393_v50, %v390_v48 }
 0x110   :  { %v2281_v51 = vpop.f32.mrf.mxu0 }
 0x112   :  { %v406_v52 = vpop.f32.mrf.mxu0 }
 0x114   :  { %v2282_v53 = vpop.f32.mrf.mxu0 }
 0x115   :  { %v436_v54 = vpack.c.bf16 %v2282_v53, %v2281_v51 }
 0x116   :  { %v409_v56 = vpop.f32.mrf.mxu0 }
 0x117   :  { %v435_v57 = vpack.c.bf16 %v409_v56, %v406_v52  ;;  %1970 = vmatprep.subr.bf16.mxu0 %v436_v54  ;;  %2389 = vmatprep.subr.bf16.mxu1 %v436_v54 }
 0x118   :  { %1971 = vmatpush3.bf16.msra.mxu0 %v428_v55  ;;  %2397 = vmatpush3.bf16.msra.mxu1 %v428_v55 }
 0x119   :  { %1972 = vmatprep.subr.bf16.mxu0 %v435_v57  ;;  %2390 = vmatprep.subr.bf16.mxu1 %v435_v57 }
 0x11c   :  { %1973 = vmatpush3.bf16.msra.mxu0 %v427_v58  ;;  %2398 = vmatpush3.bf16.msra.mxu1 %v427_v58 }
 0x11d   :  { %1974 = vmatprep.subr.bf16.mxu0 %v434_v59  ;;  %2391 = vmatprep.subr.bf16.mxu1 %v434_v59 }
 0x120   :  { %1975 = vmatpush3.bf16.msra.mxu0 %v426_v60  ;;  %2399 = vmatpush3.bf16.msra.mxu1 %v426_v60 }
 0x121   :  { %1976 = vmatprep.subr.bf16.mxu0 %v433_v61  ;;  %2392 = vmatprep.subr.bf16.mxu1 %v433_v61 }
 0x124   :  { %1977 = vmatpush3.bf16.msra.mxu0 %v425_v62  ;;  %2400 = vmatpush3.bf16.msra.mxu1 %v425_v62 }
 0x125   :  { %1978 = vmatprep.subr.bf16.mxu0 %v432_v63  ;;  %2393 = vmatprep.subr.bf16.mxu1 %v432_v63 }
 0x128   :  { %1979 = vmatpush3.bf16.msra.mxu0 %v424_v29  ;;  %2401 = vmatpush3.bf16.msra.mxu1 %v424_v29  ;;  %v2479_v29 = vld [vmem:[%s3030_s4] sm:$0xff]  }
 0x129   :  { %1980 = vmatprep.subr.bf16.mxu0 %v431_v0  ;;  %2394 = vmatprep.subr.bf16.mxu1 %v431_v0 }
 0x12c   :  { %1981 = vmatpush3.bf16.msra.mxu0 %v423_v1  ;;  %2402 = vmatpush3.bf16.msra.mxu1 %v423_v1 }
 0x12d   :  { %1982 = vmatprep.subr.bf16.mxu0 %v430_v2  ;;  %2395 = vmatprep.subr.bf16.mxu1 %v430_v2 }
 0x130   :  { %1983 = vmatpush3.bf16.msra.mxu0 %v2670_v24  ;;  %2403 = vmatpush3.bf16.msra.mxu1 %v2670_v24  ;;  %v2729_v24 = vld [vmem:[#allocation2 + $0x90] ss:$8 sps:$4 sm:$0xff]  }
 0x131   :  { %1984 = vmatprep.subr.bf16.mxu0 %v429_v3  ;;  %2396 = vmatprep.subr.bf16.mxu1 %v429_v3 }
 0x134   :  { %1985 = vmatpush3.bf16.msra.mxu0 %v421_v4  ;;  %2404 = vmatpush3.bf16.msra.mxu1 %v421_v4 }
 0x135   :  { %2283 = vmatprep.subr.bf16.mxu0 %v2478_v28 }
 0x137   :  { %637 = vmatmul.mubr.bf16.vlgmr.msra.gmra.mxu0 %v2678_v5  ;;  %645 = vmatmul.mubr.bf16.vlgmr.msra.gmra.mxu1 %v2680_v6 }
 0x138   :  { %652 = vmatprep.mubr.bf16.mxu1 %v2682_v7  ;;  %2284 = vmatpush3.bf16.msra.mxu0 %v2478_v28 }
 0x139   :  { %2285 = vmatprep.subr.bf16.mxu0 %v2479_v29 }
 0x13c   :  { %2286 = vmatpush3.bf16.msra.mxu0 %v2479_v29 }
 0x13f   :  { %653 = vmatmul.mubr.bf16.gmra.mxu1 %v2687_v8 }
 0x140   :  { %660 = vmatprep.mubr.bf16.mxu1 %v2689_v9 }
 0x147   :  { %661 = vmatmul.mubr.bf16.gmra.mxu1 %v2693_v10 }
 0x148   :  { %668 = vmatprep.mubr.bf16.mxu1 %v2695_v11 }
 0x14f   :  { %669 = vmatmul.mubr.bf16.gmra.mxu1 %v2699_v12 }
 0x150   :  { %676 = vmatprep.mubr.bf16.mxu1 %v2701_v13 }
 0x157   :  { %677 = vmatmul.mubr.bf16.gmra.mxu1 %v2705_v14 }
 0x158   :  { %684 = vmatprep.mubr.bf16.mxu1 %v2707_v15 }
 0x15f   :  { %685 = vmatmul.mubr.bf16.gmra.mxu1 %v2711_v16 }
 0x160   :  { %692 = vmatprep.mubr.bf16.mxu1 %v2713_v17 }
 0x167   :  { %693 = vmatmul.mubr.bf16.gmra.mxu1 %v2717_v18 }
 0x168   :  { %700 = vmatprep.mubr.bf16.mxu1 %v2719_v21 }
 0x16f   :  { %701 = vmatmul.mubr.bf16.gmra.mxu1 %v2723_v22 }
 0x170   :  { %708 = vmatprep.mubr.bf16.mxu1 %v2725_v23 }
 0x177   :  { %709 = vmatmul.mubr.bf16.gmra.mxu1 %v2729_v24 }
 0x178   :  { %716 = vmatprep.mubr.bf16.mxu1 %v2731_v25 }
 0x17f   :  { %717 = vmatmul.mubr.bf16.gmra.mxu1 %v2735_v26 }
 0x180   :  { %724 = vmatprep.mubr.bf16.mxu1 %v2737_v27 }
 0x187   :  { %725 = vmatmul.mubr.bf16.gmra.mxu1 %v2747_v30 }
 0x188   :  { %732 = vmatprep.mubr.bf16.mxu1 %v2749_v31 }
 0x18f   :  { %733 = vmatmul.mubr.bf16.gmra.mxu1 %v2753_v32 }
 0x190   :  { %740 = vmatprep.mubr.bf16.mxu1 %v2755_v33 }
 0x197   :  { %741 = vmatmul.mubr.bf16.gmra.mxu1 %v2759_v34 }
 0x198   :  { %748 = vmatprep.mubr.bf16.mxu1 %v2761_v35 }
 0x19f   :  { %749 = vmatmul.mubr.bf16.gmra.mxu1 %v2765_v36 }
 0x1a0   :  { %756 = vmatprep.mubr.bf16.mxu1 %v2767_v37 }
 0x1a7   :  { %757 = vmatmul.mubr.bf16.gmra.mxu1 %v2771_v38 }
 0x1f7   :  { %v1986_v39 = vpop.f32.mrf.mxu0  ;;  %v1992_v40 = vpop.f32.mrf.mxu1 }
 0x1f9   :  { %v1987_v41 = vpop.f32.mrf.mxu0  ;;  %v1993_v42 = vpop.f32.mrf.mxu1 }
 0x1fa   :  { %v1988_v43 = vadd.f32 %v1987_v41, %v1986_v39  ;;  %v1994_v44 = vadd.f32 %v1993_v42, %v1992_v40 }
 0x1fb   :  { %v1989_v46 = vpop.f32.mrf.mxu0  ;;  %v1995_v47 = vpop.f32.mrf.mxu1 }
 0x1fc   :  { %v639_v48 = vadd.f32 %v1988_v43, %v2777_v45  ;;  %v647_v51 = vadd.f32 %v1994_v44, %v2777_v45 }
 0x1fd   :  { %v1990_v49 = vpop.f32.mrf.mxu0  ;;  %v1996_v50 = vpop.f32.mrf.mxu1 }
 0x1fe   :  { %v1991_v52 = vadd.f32 %v1990_v49, %v1989_v46  ;;  %v1997_v53 = vadd.f32 %v1996_v50, %v1995_v47  ;;  %v765_v55 = vmax.f32 %v639_v48, 0.0  ;;  %v767_v59 = vmax.f32 %v647_v51, 0.0 }
 0x1ff   :  { %v1998_v54 = vpop.f32.mrf.mxu1 }
 0x200   :  { %v642_v56 = vadd.f32 %v1991_v52, %v2777_v45  ;;  %v650_v57 = vadd.f32 %v1997_v53, %v2777_v45 }
 0x201   :  { %v1999_v58 = vpop.f32.mrf.mxu1 }
 0x202   :  { %v766_v60 = vmax.f32 %v642_v56, 0.0  ;;  %v768_v61 = vmax.f32 %v650_v57, 0.0  ;;  %v2000_v62 = vadd.f32 %v1999_v58, %v1998_v54 }
 0x203   :  { %v2001_v63 = vpop.f32.mrf.mxu1 }
 0x204   :  { %v797_v0 = vpack.c.bf16 %v766_v60, %v765_v55  ;;  %v798_v1 = vpack.c.bf16 %v768_v61, %v767_v59  ;;  %v655_v3 = vadd.f32 %v2000_v62, %v2777_v45 }
 0x205   :  { %v2002_v2 = vpop.f32.mrf.mxu1 }
 0x206   :  { %v2003_v4 = vadd.f32 %v2002_v2, %v2001_v63  ;;  %2287 = vmatprep.mubr.msk.bf16.mxu0 %vm829_vm2, %v797_v0  ;;  %v769_v40 = vmax.f32 %v655_v3, 0.0 }
 0x207   :  { %v2004_v28 = vpop.f32.mrf.mxu1  ;;  %2288 = vmatmul.mubr.msk.bf16.vlgmr.msra.gmra.mxu0 %vm829_vm2, %v798_v1 }
 0x208   :  { %v658_v29 = vadd.f32 %v2003_v4, %v2777_v45 }
 0x209   :  { %v2005_v39 = vpop.f32.mrf.mxu1 }
 0x20a   :  { %v770_v41 = vmax.f32 %v658_v29, 0.0  ;;  %v2006_v42 = vadd.f32 %v2005_v39, %v2004_v28 }
 0x20b   :  { %v2007_v43 = vpop.f32.mrf.mxu1 }
 0x20c   :  { %v799_v44 = vpack.c.bf16 %v770_v41, %v769_v40  ;;  %v663_v47 = vadd.f32 %v2006_v42, %v2777_v45 }
 0x20d   :  { %v2008_v46 = vpop.f32.mrf.mxu1 }
 0x20e   :  { %v2009_v48 = vadd.f32 %v2008_v46, %v2007_v43  ;;  %2291 = vmatprep.mubr.msk.bf16.mxu0 %vm829_vm2, %v799_v44  ;;  %v771_v52 = vmax.f32 %v663_v47, 0.0 }
 0x20f   :  { %v2010_v49 = vpop.f32.mrf.mxu1 }
 0x210   :  { %v666_v50 = vadd.f32 %v2009_v48, %v2777_v45 }
 0x211   :  { %v2011_v51 = vpop.f32.mrf.mxu1 }
 0x212   :  { %v772_v53 = vmax.f32 %v666_v50, 0.0  ;;  %v2012_v54 = vadd.f32 %v2011_v51, %v2010_v49 }
 0x213   :  { %v2013_v55 = vpop.f32.mrf.mxu1 }
 0x214   :  { %v800_v56 = vpack.c.bf16 %v772_v53, %v771_v52  ;;  %v671_v58 = vadd.f32 %v2012_v54, %v2777_v45 }
 0x215   :  { %v2014_v57 = vpop.f32.mrf.mxu1 }
 0x216   :  { %v2015_v59 = vadd.f32 %v2014_v57, %v2013_v55  ;;  %2292 = vmatmul.mubr.msk.bf16.gmra.mxu0 %vm829_vm2, %v800_v56  ;;  %v773_v63 = vmax.f32 %v671_v58, 0.0 }
 0x217   :  { %v2016_v60 = vpop.f32.mrf.mxu1 }
 0x218   :  { %v674_v61 = vadd.f32 %v2015_v59, %v2777_v45 }
 0x219   :  { %v2017_v62 = vpop.f32.mrf.mxu1 }
 0x21a   :  { %v774_v0 = vmax.f32 %v674_v61, 0.0  ;;  %v2018_v1 = vadd.f32 %v2017_v62, %v2016_v60 }
 0x21b   :  { %v2019_v2 = vpop.f32.mrf.mxu1 }
 0x21c   :  { %v801_v3 = vpack.c.bf16 %v774_v0, %v773_v63  ;;  %v679_v28 = vadd.f32 %v2018_v1, %v2777_v45 }
 0x21d   :  { %v2020_v4 = vpop.f32.mrf.mxu1 }
 0x21e   :  { %v2021_v29 = vadd.f32 %v2020_v4, %v2019_v2  ;;  %2295 = vmatprep.mubr.msk.bf16.mxu0 %vm829_vm2, %v801_v3  ;;  %v775_v42 = vmax.f32 %v679_v28, 0.0 }
 0x21f   :  { %v2022_v39 = vpop.f32.mrf.mxu1 }
 0x220   :  { %v682_v40 = vadd.f32 %v2021_v29, %v2777_v45 }
 0x221   :  { %v2023_v41 = vpop.f32.mrf.mxu1 }
 0x222   :  { %v776_v43 = vmax.f32 %v682_v40, 0.0  ;;  %v2024_v44 = vadd.f32 %v2023_v41, %v2022_v39 }
 0x223   :  { %v2025_v46 = vpop.f32.mrf.mxu1 }
 0x224   :  { %v802_v47 = vpack.c.bf16 %v776_v43, %v775_v42  ;;  %v687_v49 = vadd.f32 %v2024_v44, %v2777_v45 }
 0x225   :  { %v2026_v48 = vpop.f32.mrf.mxu1 }
 0x226   :  { %v2027_v50 = vadd.f32 %v2026_v48, %v2025_v46  ;;  %2296 = vmatmul.mubr.msk.bf16.gmra.mxu0 %vm829_vm2, %v802_v47  ;;  %v777_v54 = vmax.f32 %v687_v49, 0.0 }
 0x227   :  { %v2028_v51 = vpop.f32.mrf.mxu1 }
 0x228   :  { %v690_v52 = vadd.f32 %v2027_v50, %v2777_v45 }
 0x229   :  { %v2029_v53 = vpop.f32.mrf.mxu1 }
 0x22a   :  { %v778_v55 = vmax.f32 %v690_v52, 0.0  ;;  %v2030_v56 = vadd.f32 %v2029_v53, %v2028_v51 }
 0x22b   :  { %v2031_v57 = vpop.f32.mrf.mxu1 }
 0x22c   :  { %v803_v58 = vpack.c.bf16 %v778_v55, %v777_v54  ;;  %v695_v60 = vadd.f32 %v2030_v56, %v2777_v45 }
 0x22d   :  { %v2032_v59 = vpop.f32.mrf.mxu1 }
 0x22e   :  { %v2033_v61 = vadd.f32 %v2032_v59, %v2031_v57  ;;  %2299 = vmatprep.mubr.msk.bf16.mxu0 %vm829_vm2, %v803_v58  ;;  %v779_v1 = vmax.f32 %v695_v60, 0.0 }
 0x22f   :  { %v2034_v62 = vpop.f32.mrf.mxu1 }
 0x230   :  { %v698_v63 = vadd.f32 %v2033_v61, %v2777_v45 }
 0x231   :  { %v2035_v0 = vpop.f32.mrf.mxu1 }
 0x232   :  { %v780_v2 = vmax.f32 %v698_v63, 0.0  ;;  %v2036_v3 = vadd.f32 %v2035_v0, %v2034_v62 }
 0x233   :  { %v2037_v4 = vpop.f32.mrf.mxu1 }
 0x234   :  { %v804_v28 = vpack.c.bf16 %v780_v2, %v779_v1  ;;  %v703_v39 = vadd.f32 %v2036_v3, %v2777_v45 }
 0x235   :  { %v2038_v29 = vpop.f32.mrf.mxu1 }
 0x236   :  { %v2039_v40 = vadd.f32 %v2038_v29, %v2037_v4  ;;  %2300 = vmatmul.mubr.msk.bf16.gmra.mxu0 %vm829_vm2, %v804_v28  ;;  %v781_v44 = vmax.f32 %v703_v39, 0.0 }
 0x237   :  { %v2040_v41 = vpop.f32.mrf.mxu1 }
 0x238   :  { %v706_v42 = vadd.f32 %v2039_v40, %v2777_v45 }
 0x239   :  { %v2041_v43 = vpop.f32.mrf.mxu1 }
 0x23a   :  { %v782_v46 = vmax.f32 %v706_v42, 0.0  ;;  %v2042_v47 = vadd.f32 %v2041_v43, %v2040_v41 }
 0x23b   :  { %v2043_v48 = vpop.f32.mrf.mxu1 }
 0x23c   :  { %v805_v49 = vpack.c.bf16 %v782_v46, %v781_v44  ;;  %v711_v51 = vadd.f32 %v2042_v47, %v2777_v45 }
 0x23d   :  { %v2044_v50 = vpop.f32.mrf.mxu1 }
 0x23e   :  { %v2045_v52 = vadd.f32 %v2044_v50, %v2043_v48  ;;  %2303 = vmatprep.mubr.msk.bf16.mxu0 %vm829_vm2, %v805_v49  ;;  %v783_v56 = vmax.f32 %v711_v51, 0.0 }
 0x23f   :  { %v2046_v53 = vpop.f32.mrf.mxu1 }
 0x240   :  { %v714_v54 = vadd.f32 %v2045_v52, %v2777_v45 }
 0x241   :  { %v2047_v55 = vpop.f32.mrf.mxu1 }
 0x242   :  { %v784_v57 = vmax.f32 %v714_v54, 0.0  ;;  %v2048_v58 = vadd.f32 %v2047_v55, %v2046_v53 }
 0x243   :  { %v2049_v59 = vpop.f32.mrf.mxu1 }
 0x244   :  { %v806_v60 = vpack.c.bf16 %v784_v57, %v783_v56  ;;  %v719_v62 = vadd.f32 %v2048_v58, %v2777_v45 }
 0x245   :  { %v2050_v61 = vpop.f32.mrf.mxu1 }
 0x246   :  { %v2051_v63 = vadd.f32 %v2050_v61, %v2049_v59  ;;  %2304 = vmatmul.mubr.msk.bf16.gmra.mxu0 %vm829_vm2, %v806_v60  ;;  %v785_v3 = vmax.f32 %v719_v62, 0.0 }
 0x247   :  { %v2052_v0 = vpop.f32.mrf.mxu1 }
 0x248   :  { %v722_v1 = vadd.f32 %v2051_v63, %v2777_v45 }
 0x249   :  { %v2053_v2 = vpop.f32.mrf.mxu1 }
 0x24a   :  { %v786_v4 = vmax.f32 %v722_v1, 0.0  ;;  %v2054_v28 = vadd.f32 %v2053_v2, %v2052_v0 }
 0x24b   :  { %v2055_v29 = vpop.f32.mrf.mxu1 }
 0x24c   :  { %v807_v39 = vpack.c.bf16 %v786_v4, %v785_v3  ;;  %v727_v41 = vadd.f32 %v2054_v28, %v2777_v45 }
 0x24d   :  { %v2056_v40 = vpop.f32.mrf.mxu1 }
 0x24e   :  { %v2057_v42 = vadd.f32 %v2056_v40, %v2055_v29  ;;  %2307 = vmatprep.mubr.msk.bf16.mxu0 %vm829_vm2, %v807_v39  ;;  %v787_v47 = vmax.f32 %v727_v41, 0.0 }
 0x24f   :  { %v2058_v43 = vpop.f32.mrf.mxu1 }
 0x250   :  { %v730_v44 = vadd.f32 %v2057_v42, %v2777_v45 }
 0x251   :  { %v2059_v46 = vpop.f32.mrf.mxu1 }
 0x252   :  { %v788_v48 = vmax.f32 %v730_v44, 0.0  ;;  %v2060_v49 = vadd.f32 %v2059_v46, %v2058_v43 }
 0x253   :  { %v2061_v50 = vpop.f32.mrf.mxu1 }
 0x254   :  { %v808_v51 = vpack.c.bf16 %v788_v48, %v787_v47  ;;  %v735_v53 = vadd.f32 %v2060_v49, %v2777_v45 }
 0x255   :  { %v2062_v52 = vpop.f32.mrf.mxu1 }
 0x256   :  { %v2063_v54 = vadd.f32 %v2062_v52, %v2061_v50  ;;  %2308 = vmatmul.mubr.msk.bf16.gmra.mxu0 %vm829_vm2, %v808_v51  ;;  %v789_v58 = vmax.f32 %v735_v53, 0.0 }
 0x257   :  { %v2064_v55 = vpop.f32.mrf.mxu1 }
 0x258   :  { %v738_v56 = vadd.f32 %v2063_v54, %v2777_v45 }
 0x259   :  { %v2065_v57 = vpop.f32.mrf.mxu1 }
 0x25a   :  { %v790_v59 = vmax.f32 %v738_v56, 0.0  ;;  %v2066_v60 = vadd.f32 %v2065_v57, %v2064_v55 }
 0x25b   :  { %v2067_v61 = vpop.f32.mrf.mxu1 }
 0x25c   :  { %v809_v62 = vpack.c.bf16 %v790_v59, %v789_v58  ;;  %v743_v0 = vadd.f32 %v2066_v60, %v2777_v45 }
 0x25d   :  { %v2068_v63 = vpop.f32.mrf.mxu1 }
 0x25e   :  { %v2069_v1 = vadd.f32 %v2068_v63, %v2067_v61  ;;  %2311 = vmatprep.mubr.msk.bf16.mxu0 %vm829_vm2, %v809_v62  ;;  %v791_v28 = vmax.f32 %v743_v0, 0.0 }
 0x25f   :  { %v2070_v2 = vpop.f32.mrf.mxu1 }
 0x260   :  { %v746_v3 = vadd.f32 %v2069_v1, %v2777_v45 }
 0x261   :  { %v2071_v4 = vpop.f32.mrf.mxu1 }
 0x262   :  { %v792_v29 = vmax.f32 %v746_v3, 0.0  ;;  %v2072_v39 = vadd.f32 %v2071_v4, %v2070_v2 }
 0x263   :  { %v2073_v40 = vpop.f32.mrf.mxu1 }
 0x264   :  { %v810_v41 = vpack.c.bf16 %v792_v29, %v791_v28  ;;  %v751_v43 = vadd.f32 %v2072_v39, %v2777_v45 }
 0x265   :  { %v2074_v42 = vpop.f32.mrf.mxu1 }
 0x266   :  { %v2075_v44 = vadd.f32 %v2074_v42, %v2073_v40  ;;  %2312 = vmatmul.mubr.msk.bf16.gmra.mxu0 %vm829_vm2, %v810_v41  ;;  %v793_v49 = vmax.f32 %v751_v43, 0.0 }
 0x267   :  { %v2076_v46 = vpop.f32.mrf.mxu1 }
 0x268   :  { %v754_v47 = vadd.f32 %v2075_v44, %v2777_v45 }
 0x269   :  { %v2077_v48 = vpop.f32.mrf.mxu1 }
 0x26a   :  { %v794_v50 = vmax.f32 %v754_v47, 0.0  ;;  %v2078_v51 = vadd.f32 %v2077_v48, %v2076_v46 }
 0x26b   :  { %v2079_v52 = vpop.f32.mrf.mxu1 }
 0x26c   :  { %v811_v53 = vpack.c.bf16 %v794_v50, %v793_v49  ;;  %v759_v55 = vadd.f32 %v2078_v51, %v2777_v45 }
 0x26d   :  { %v2080_v54 = vpop.f32.mrf.mxu1 }
 0x26e   :  { %v2081_v56 = vadd.f32 %v2080_v54, %v2079_v52  ;;  %2315 = vmatprep.mubr.msk.bf16.mxu0 %vm829_vm2, %v811_v53  ;;  %v795_v58 = vmax.f32 %v759_v55, 0.0 }
 0x270   :  { %v762_v57 = vadd.f32 %v2081_v56, %v2777_v45 }
 0x272   :  { %v796_v59 = vmax.f32 %v762_v57, 0.0 }
 0x274   :  { %v812_v60 = vpack.c.bf16 %v796_v59, %v795_v58 }
 0x276   :  { %2316 = vmatmul.mubr.msk.bf16.gmra.mxu0 %vm829_vm2, %v812_v60 }
 0x277   :  { %1094 = vmatprep.mubr.bf16.mxu0 %v2662_v19 }
 0x2c7   :  { %v2828_v61 = vpop.f32.mrf.mxu0 }
 0x2c9   :  { %v2830_v62 = vpop.f32.mrf.mxu0 }
 0x2cb   :  { %v2290_v63 = vpop.f32.mrf.mxu0 }
 0x2cc   :  { %v1040_v0 = vpack.c.bf16 %v2290_v63, %v2828_v61 }
 0x2cd   :  { %v2833_v1 = vpop.f32.mrf.mxu0 }
 0x2ce   :  { %v1039_v2 = vpack.c.bf16 %v2833_v1, %v2830_v62 }
 0x2d6   :  { %v2293_v45 = vpop.f32.mrf.mxu0 }
 0x2d8   :  { %v928_v3 = vpop.f32.mrf.mxu0 }
 0x2da   :  { %v2294_v4 = vpop.f32.mrf.mxu0 }
 0x2db   :  { %v1042_v28 = vpack.c.bf16 %v2294_v4, %v2293_v45 }
 0x2dc   :  { %v931_v29 = vpop.f32.mrf.mxu0 }
 0x2dd   :  { %v1041_v39 = vpack.c.bf16 %v931_v29, %v928_v3 }
 0x2e6   :  { %v2297_v40 = vpop.f32.mrf.mxu0 }
 0x2e8   :  { %v944_v19 = vpop.f32.mrf.mxu0 }
 0x2ea   :  { %v2298_v41 = vpop.f32.mrf.mxu0 }
 0x2eb   :  { %v1044_v38 = vpack.c.bf16 %v2298_v41, %v2297_v40 }
 0x2ec   :  { %v947_v42 = vpop.f32.mrf.mxu0 }
 0x2ed   :  { %v1043_v36 = vpack.c.bf16 %v947_v42, %v944_v19 }
 0x2f6   :  { %v2301_v43 = vpop.f32.mrf.mxu0 }
 0x2f8   :  { %v960_v44 = vpop.f32.mrf.mxu0 }
 0x2fa   :  { %v2302_v46 = vpop.f32.mrf.mxu0 }
 0x2fb   :  { %v1046_v1 = vpack.c.bf16 %v2302_v46, %v2301_v43 }
 0x2fc   :  { %v963_v47 = vpop.f32.mrf.mxu0 }
 0x2fd   :  { %v1045_v4 = vpack.c.bf16 %v963_v47, %v960_v44  ;;  %v2480_v44 = vld [vmem:[%s3032_s6 + $0x8] ss:$0 sps:$4 sm:$0x33]  }
 0x2fe   :  { %2406 = vmatprep.subr.msk.bf16.mxu1 %vm1339_vm3, %v2480_v44 }
 0x306   :  { %v2305_v48 = vpop.f32.mrf.mxu0 }
 0x308   :  { %v976_v49 = vpop.f32.mrf.mxu0 }
 0x30a   :  { %v2306_v50 = vpop.f32.mrf.mxu0 }
 0x30b   :  { %v1048_v43 = vpack.c.bf16 %v2306_v50, %v2305_v48 }
 0x30c   :  { %v979_v51 = vpop.f32.mrf.mxu0 }
 0x30d   :  { %v1047_v46 = vpack.c.bf16 %v979_v51, %v976_v49 }
 0x316   :  { %v2309_v52 = vpop.f32.mrf.mxu0 }
 0x318   :  { %v992_v53 = vpop.f32.mrf.mxu0 }
 0x31a   :  { %v2310_v54 = vpop.f32.mrf.mxu0 }
 0x31b   :  { %v1050_v35 = vpack.c.bf16 %v2310_v54, %v2309_v52 }
 0x31c   :  { %v995_v55 = vpop.f32.mrf.mxu0 }
 0x31d   :  { %v1049_v34 = vpack.c.bf16 %v995_v55, %v992_v53 }
 0x326   :  { %v2313_v56 = vpop.f32.mrf.mxu0 }
 0x328   :  { %v1008_v57 = vpop.f32.mrf.mxu0 }
 0x32a   :  { %v2314_v58 = vpop.f32.mrf.mxu0 }
 0x32b   :  { %v1052_v29 = vpack.c.bf16 %v2314_v58, %v2313_v56 }
 0x32c   :  { %v1011_v59 = vpop.f32.mrf.mxu0 }
 0x32d   :  { %v1051_v37 = vpack.c.bf16 %v1011_v59, %v1008_v57 }
 0x336   :  { %v2317_v60 = vpop.f32.mrf.mxu0 }
 0x338   :  { %v1024_v61 = vpop.f32.mrf.mxu0 }
 0x33a   :  { %v2318_v62 = vpop.f32.mrf.mxu0 }
 0x33b   :  { %v1054_v63 = vpack.c.bf16 %v2318_v62, %v2317_v60 }
 0x33c   :  { %v1027_v45 = vpop.f32.mrf.mxu0 }
 0x33d   :  { %v1053_v3 = vpack.c.bf16 %v1027_v45, %v1024_v61  ;;  %2100 = vmatprep.subr.bf16.mxu0 %v1054_v63 }
 0x33e   :  { %2101 = vmatpush3.bf16.msra.mxu0 %v1046_v1 }
 0x33f   :  { %2102 = vmatprep.subr.bf16.mxu0 %v1053_v3 }
 0x342   :  { %2103 = vmatpush3.bf16.msra.mxu0 %v1045_v4 }
 0x343   :  { %2104 = vmatprep.subr.bf16.mxu0 %v1052_v29 }
 0x346   :  { %2105 = vmatpush3.bf16.msra.mxu0 %v1044_v38 }
 0x347   :  { %2106 = vmatprep.subr.bf16.mxu0 %v1051_v37  ;;  %v1341_v37 = vsel %vm1339_vm3, %v2480_v44, 0 }
 0x348   :  { %2320 = vmatpush3.bf16.msra.mxu1 %v1341_v37 }
 0x34a   :  { %2107 = vmatpush3.bf16.msra.mxu0 %v1043_v36 }
 0x34b   :  { %2108 = vmatprep.subr.bf16.mxu0 %v1050_v35 }
 0x34e   :  { %2109 = vmatpush3.bf16.msra.mxu0 %v1042_v28 }
 0x34f   :  { %2110 = vmatprep.subr.bf16.mxu0 %v1049_v34 }
 0x352   :  { %2111 = vmatpush3.bf16.msra.mxu0 %v1041_v39 }
 0x353   :  { %2112 = vmatprep.subr.bf16.mxu0 %v1048_v43 }
 0x356   :  { %2113 = vmatpush3.bf16.msra.mxu0 %v1040_v0 }
 0x357   :  { %2114 = vmatprep.subr.bf16.mxu0 %v1047_v46 }
 0x35a   :  { %2115 = vmatpush3.bf16.msra.mxu0 %v1039_v2 }
 0x35d   :  { %1095 = vmatmul.mubr.bf16.vlgmr.msra.gmra.mxu0 %v2678_v5  ;;  %v3047_v5 = vld [vmem:[#allocation8_spill] sm:$0xff] }
 0x35e   :  { %1102 = vmatprep.mubr.bf16.mxu0 %v2664_v20  ;;  %v2481_v20 = vld [vmem:[%s3032_s6] sm:$0xff]  }
 0x35f   :  { %2321 = vmatprep.subr.bf16.mxu1 %v2481_v20 }
 0x360   :  { %2322 = vmatpush3.bf16.msra.mxu1 %v2481_v20 }
 0x365   :  { %1103 = vmatmul.mubr.bf16.gmra.mxu0 %v2680_v6  ;;  %v3048_v6 = vld [vmem:[#allocation9_spill] sm:$0xff] }
 0x366   :  { %1110 = vmatprep.mubr.bf16.mxu0 %v2682_v7  ;;  %v3049_v7 = vld [vmem:[#allocation10_spill] sm:$0xff] }
 0x36d   :  { %1111 = vmatmul.mubr.bf16.gmra.mxu0 %v2687_v8  ;;  %v3050_v8 = vld [vmem:[#allocation11_spill] sm:$0xff] }
 0x36e   :  { %1118 = vmatprep.mubr.bf16.mxu0 %v2689_v9  ;;  %v3051_v9 = vld [vmem:[#allocation12_spill] sm:$0xff] }
 0x375   :  { %1119 = vmatmul.mubr.bf16.gmra.mxu0 %v2693_v10 }
 0x376   :  { %1126 = vmatprep.mubr.bf16.mxu0 %v2695_v11 }
 0x37d   :  { %1127 = vmatmul.mubr.bf16.gmra.mxu0 %v2699_v12 }
 0x37e   :  { %1134 = vmatprep.mubr.bf16.mxu0 %v2701_v13  ;;  %v2877_v13 = vld [vmem:[%s3031_s5] ss:$0 sm:$0xff] }
 0x385   :  { %1135 = vmatmul.mubr.bf16.gmra.mxu0 %v2705_v14 }
 0x386   :  { %1142 = vmatprep.mubr.bf16.mxu0 %v2707_v15 }
 0x38d   :  { %1143 = vmatmul.mubr.bf16.gmra.mxu0 %v2711_v16 }
 0x38e   :  { %1150 = vmatprep.mubr.bf16.mxu0 %v2713_v17 }
 0x395   :  { %1151 = vmatmul.mubr.bf16.gmra.mxu0 %v2717_v18 }
 0x396   :  { %1158 = vmatprep.mubr.bf16.mxu0 %v2719_v21 }
 0x39d   :  { %1159 = vmatmul.mubr.bf16.gmra.mxu0 %v2723_v22 }
 0x39e   :  { %1166 = vmatprep.mubr.bf16.mxu0 %v2725_v23 }
 0x3a5   :  { %1167 = vmatmul.mubr.bf16.gmra.mxu0 %v2729_v24 }
 0x3a6   :  { %1174 = vmatprep.mubr.bf16.mxu0 %v2731_v25 }
 0x3ad   :  { %1175 = vmatmul.mubr.bf16.gmra.mxu0 %v2735_v26 }
 0x3ae   :  { %1182 = vmatprep.mubr.bf16.mxu0 %v2737_v27 }
 0x3b5   :  { %1183 = vmatmul.mubr.bf16.gmra.mxu0 %v2747_v30 }
 0x3b6   :  { %1190 = vmatprep.mubr.bf16.mxu0 %v2749_v31 }
 0x3bd   :  { %1191 = vmatmul.mubr.bf16.gmra.mxu0 %v2753_v32 }
 0x3be   :  { %1198 = vmatprep.mubr.bf16.mxu0 %v2755_v33 }
 0x3c5   :  { %1199 = vmatmul.mubr.bf16.gmra.mxu0 %v3047_v5 }
 0x3c6   :  { %1206 = vmatprep.mubr.bf16.mxu0 %v3048_v6 }
 0x3cd   :  { %1207 = vmatmul.mubr.bf16.gmra.mxu0 %v3049_v7 }
 0x3ce   :  { %1214 = vmatprep.mubr.bf16.mxu0 %v3050_v8 }
 0x3d5   :  { %1215 = vmatmul.mubr.bf16.gmra.mxu0 %v3051_v9 }
 0x41d   :  { %v2116_v10 = vpop.f32.mrf.mxu0 }
 0x41f   :  { %v2117_v11 = vpop.f32.mrf.mxu0 }
 0x420   :  { %v2118_v12 = vadd.f32 %v2117_v11, %v2116_v10 }
 0x421   :  { %v2119_v14 = vpop.f32.mrf.mxu0 }
 0x422   :  { %v1097_v16 = vadd.f32 %v2118_v12, %v2877_v13 }
 0x423   :  { %v2120_v15 = vpop.f32.mrf.mxu0 }
 0x424   :  { %v2121_v17 = vadd.f32 %v2120_v15, %v2119_v14  ;;  %v1223_v23 = vmax.f32 %v1097_v16, 0.0 }
 0x425   :  { %v2122_v18 = vpop.f32.mrf.mxu0 }
 0x426   :  { %v1100_v21 = vadd.f32 %v2121_v17, %v2877_v13 }
 0x427   :  { %v2123_v22 = vpop.f32.mrf.mxu0 }
 0x428   :  { %v1224_v24 = vmax.f32 %v1100_v21, 0.0  ;;  %v2124_v25 = vadd.f32 %v2123_v22, %v2122_v18 }
 0x429   :  { %v2125_v26 = vpop.f32.mrf.mxu0 }
 0x42a   :  { %v1255_v27 = vpack.c.bf16 %v1224_v24, %v1223_v23  ;;  %v1105_v31 = vadd.f32 %v2124_v25, %v2877_v13 }
 0x42b   :  { %v2126_v30 = vpop.f32.mrf.mxu0 }
 0x42c   :  { %v2127_v32 = vadd.f32 %v2126_v30, %v2125_v26  ;;  %2323 = vmatprep.mubr.msk.bf16.mxu1 %vm1290_vm4, %v1255_v27  ;;  %v1225_v36 = vmax.f32 %v1105_v31, 0.0 }
 0x42d   :  { %v2128_v33 = vpop.f32.mrf.mxu0 }
 0x42e   :  { %v1108_v34 = vadd.f32 %v2127_v32, %v2877_v13 }
 0x42f   :  { %v2129_v35 = vpop.f32.mrf.mxu0 }
 0x430   :  { %v1226_v38 = vmax.f32 %v1108_v34, 0.0  ;;  %v2130_v0 = vadd.f32 %v2129_v35, %v2128_v33 }
 0x431   :  { %v2131_v2 = vpop.f32.mrf.mxu0 }
 0x432   :  { %v1256_v28 = vpack.c.bf16 %v1226_v38, %v1225_v36  ;;  %v1113_v40 = vadd.f32 %v2130_v0, %v2877_v13 }
 0x433   :  { %v2132_v39 = vpop.f32.mrf.mxu0 }
 0x434   :  { %v2133_v19 = vadd.f32 %v2132_v39, %v2131_v2  ;;  %2324 = vmatmul.mubr.msk.bf16.vlgmr.msra.gmra.mxu1 %vm1290_vm4, %v1256_v28  ;;  %v1227_v48 = vmax.f32 %v1113_v40, 0.0 }
 0x435   :  { %v2134_v41 = vpop.f32.mrf.mxu0 }
 0x436   :  { %v1116_v42 = vadd.f32 %v2133_v19, %v2877_v13 }
 0x437   :  { %v2135_v47 = vpop.f32.mrf.mxu0 }
 0x438   :  { %v1228_v49 = vmax.f32 %v1116_v42, 0.0  ;;  %v2136_v50 = vadd.f32 %v2135_v47, %v2134_v41 }
 0x439   :  { %v2137_v51 = vpop.f32.mrf.mxu0 }
 0x43a   :  { %v1257_v52 = vpack.c.bf16 %v1228_v49, %v1227_v48  ;;  %v1121_v54 = vadd.f32 %v2136_v50, %v2877_v13 }
 0x43b   :  { %v2138_v53 = vpop.f32.mrf.mxu0 }
 0x43c   :  { %v2139_v55 = vadd.f32 %v2138_v53, %v2137_v51  ;;  %2327 = vmatprep.mubr.msk.bf16.mxu1 %vm1290_vm4, %v1257_v52  ;;  %v1229_v59 = vmax.f32 %v1121_v54, 0.0 }
 0x43d   :  { %v2140_v56 = vpop.f32.mrf.mxu0 }
 0x43e   :  { %v1124_v57 = vadd.f32 %v2139_v55, %v2877_v13 }
 0x43f   :  { %v2141_v58 = vpop.f32.mrf.mxu0 }
 0x440   :  { %v1230_v60 = vmax.f32 %v1124_v57, 0.0  ;;  %v2142_v61 = vadd.f32 %v2141_v58, %v2140_v56 }
 0x441   :  { %v2143_v62 = vpop.f32.mrf.mxu0 }
 0x442   :  { %v1258_v63 = vpack.c.bf16 %v1230_v60, %v1229_v59  ;;  %v1129_v45 = vadd.f32 %v2142_v61, %v2877_v13 }
 0x443   :  { %v2144_v1 = vpop.f32.mrf.mxu0 }
 0x444   :  { %v2145_v3 = vadd.f32 %v2144_v1, %v2143_v62  ;;  %2328 = vmatmul.mubr.msk.bf16.gmra.mxu1 %vm1290_vm4, %v1258_v63  ;;  %v1231_v46 = vmax.f32 %v1129_v45, 0.0 }
 0x445   :  { %v2146_v4 = vpop.f32.mrf.mxu0 }
 0x446   :  { %v1132_v29 = vadd.f32 %v2145_v3, %v2877_v13 }
 0x447   :  { %v2147_v43 = vpop.f32.mrf.mxu0 }
 0x448   :  { %v1232_v44 = vmax.f32 %v1132_v29, 0.0  ;;  %v2148_v37 = vadd.f32 %v2147_v43, %v2146_v4 }
 0x449   :  { %v2149_v20 = vpop.f32.mrf.mxu0 }
 0x44a   :  { %v1259_v5 = vpack.c.bf16 %v1232_v44, %v1231_v46  ;;  %v1137_v7 = vadd.f32 %v2148_v37, %v2877_v13 }
 0x44b   :  { %v2150_v6 = vpop.f32.mrf.mxu0 }
 0x44c   :  { %v2151_v8 = vadd.f32 %v2150_v6, %v2149_v20  ;;  %2331 = vmatprep.mubr.msk.bf16.mxu1 %vm1290_vm4, %v1259_v5  ;;  %v1233_v12 = vmax.f32 %v1137_v7, 0.0 }
 0x44d   :  { %v2152_v9 = vpop.f32.mrf.mxu0 }
 0x44e   :  { %v1140_v10 = vadd.f32 %v2151_v8, %v2877_v13 }
 0x44f   :  { %v2153_v11 = vpop.f32.mrf.mxu0 }
 0x450   :  { %v1234_v14 = vmax.f32 %v1140_v10, 0.0  ;;  %v2154_v15 = vadd.f32 %v2153_v11, %v2152_v9 }
 0x451   :  { %v2155_v16 = vpop.f32.mrf.mxu0 }
 0x452   :  { %v1260_v17 = vpack.c.bf16 %v1234_v14, %v1233_v12  ;;  %v1145_v21 = vadd.f32 %v2154_v15, %v2877_v13  ;;  %v2482_v12 = vld [vmem:[%s3034_s8] sm:$0x1f]  }
 0x453   :  { %v2156_v18 = vpop.f32.mrf.mxu0  ;;  %2407 = vmatprep.subr.msk.bf16.mxu1 %vm1615_vm5, %v2482_v12 }
 0x454   :  { %v2157_v22 = vadd.f32 %v2156_v18, %v2155_v16  ;;  %2332 = vmatmul.mubr.msk.bf16.gmra.mxu1 %vm1290_vm4, %v1260_v17  ;;  %v1235_v26 = vmax.f32 %v1145_v21, 0.0  ;;  %v1617_v16 = vsel %vm1615_vm5, %v2482_v12, 0 }
 0x455   :  { %v2158_v23 = vpop.f32.mrf.mxu0  ;;  %2356 = vmatpush3.bf16.msra.mxu1 %v1617_v16 }
 0x456   :  { %v1148_v24 = vadd.f32 %v2157_v22, %v2877_v13 }
 0x457   :  { %v2159_v25 = vpop.f32.mrf.mxu0 }
 0x458   :  { %v1236_v27 = vmax.f32 %v1148_v24, 0.0  ;;  %v2160_v30 = vadd.f32 %v2159_v25, %v2158_v23 }
 0x459   :  { %v2161_v31 = vpop.f32.mrf.mxu0 }
 0x45a   :  { %v1261_v32 = vpack.c.bf16 %v1236_v27, %v1235_v26  ;;  %v1153_v34 = vadd.f32 %v2160_v30, %v2877_v13 }
 0x45b   :  { %v2162_v33 = vpop.f32.mrf.mxu0 }
 0x45c   :  { %v2163_v35 = vadd.f32 %v2162_v33, %v2161_v31  ;;  %2335 = vmatprep.mubr.msk.bf16.mxu1 %vm1290_vm4, %v1261_v32  ;;  %v1237_v2 = vmax.f32 %v1153_v34, 0.0 }
 0x45d   :  { %v2164_v36 = vpop.f32.mrf.mxu0 }
 0x45e   :  { %v1156_v38 = vadd.f32 %v2163_v35, %v2877_v13 }
 0x45f   :  { %v2165_v0 = vpop.f32.mrf.mxu0 }
 0x460   :  { %v1238_v28 = vmax.f32 %v1156_v38, 0.0  ;;  %v2166_v39 = vadd.f32 %v2165_v0, %v2164_v36 }
 0x461   :  { %v2167_v40 = vpop.f32.mrf.mxu0 }
 0x462   :  { %v1262_v19 = vpack.c.bf16 %v1238_v28, %v1237_v2  ;;  %v1161_v42 = vadd.f32 %v2166_v39, %v2877_v13 }
 0x463   :  { %v2168_v41 = vpop.f32.mrf.mxu0 }
 0x464   :  { %v2169_v47 = vadd.f32 %v2168_v41, %v2167_v40  ;;  %2336 = vmatmul.mubr.msk.bf16.gmra.mxu1 %vm1290_vm4, %v1262_v19  ;;  %v1239_v51 = vmax.f32 %v1161_v42, 0.0 }
 0x465   :  { %v2170_v48 = vpop.f32.mrf.mxu0 }
 0x466   :  { %v1164_v49 = vadd.f32 %v2169_v47, %v2877_v13 }
 0x467   :  { %v2171_v50 = vpop.f32.mrf.mxu0 }
 0x468   :  { %v1240_v52 = vmax.f32 %v1164_v49, 0.0  ;;  %v2172_v53 = vadd.f32 %v2171_v50, %v2170_v48 }
 0x469   :  { %v2173_v54 = vpop.f32.mrf.mxu0 }
 0x46a   :  { %v1263_v55 = vpack.c.bf16 %v1240_v52, %v1239_v51  ;;  %v1169_v57 = vadd.f32 %v2172_v53, %v2877_v13 }
 0x46b   :  { %v2174_v56 = vpop.f32.mrf.mxu0 }
 0x46c   :  { %v2175_v58 = vadd.f32 %v2174_v56, %v2173_v54  ;;  %2339 = vmatprep.mubr.msk.bf16.mxu1 %vm1290_vm4, %v1263_v55  ;;  %v1241_v62 = vmax.f32 %v1169_v57, 0.0 }
 0x46d   :  { %v2176_v59 = vpop.f32.mrf.mxu0 }
 0x46e   :  { %v1172_v60 = vadd.f32 %v2175_v58, %v2877_v13 }
 0x46f   :  { %v2177_v61 = vpop.f32.mrf.mxu0 }
 0x470   :  { %v1242_v63 = vmax.f32 %v1172_v60, 0.0  ;;  %v2178_v1 = vadd.f32 %v2177_v61, %v2176_v59 }
 0x471   :  { %v2179_v45 = vpop.f32.mrf.mxu0 }
 0x472   :  { %v1264_v3 = vpack.c.bf16 %v1242_v63, %v1241_v62  ;;  %v1177_v29 = vadd.f32 %v2178_v1, %v2877_v13 }
 0x473   :  { %v2180_v4 = vpop.f32.mrf.mxu0 }
 0x474   :  { %v2181_v43 = vadd.f32 %v2180_v4, %v2179_v45  ;;  %2340 = vmatmul.mubr.msk.bf16.gmra.mxu1 %vm1290_vm4, %v1264_v3  ;;  %v1243_v20 = vmax.f32 %v1177_v29, 0.0 }
 0x475   :  { %v2182_v46 = vpop.f32.mrf.mxu0 }
 0x476   :  { %v1180_v44 = vadd.f32 %v2181_v43, %v2877_v13 }
 0x477   :  { %v2183_v37 = vpop.f32.mrf.mxu0 }
 0x478   :  { %v1244_v5 = vmax.f32 %v1180_v44, 0.0  ;;  %v2184_v6 = vadd.f32 %v2183_v37, %v2182_v46  ;;  %v2933_v46 = vld [vmem:[%s3033_s7] ss:$0 sm:$0xff] }
 0x479   :  { %v2185_v7 = vpop.f32.mrf.mxu0 }
 0x47a   :  { %v1265_v8 = vpack.c.bf16 %v1244_v5, %v1243_v20  ;;  %v1185_v10 = vadd.f32 %v2184_v6, %v2877_v13 }
 0x47b   :  { %v2186_v9 = vpop.f32.mrf.mxu0 }
 0x47c   :  { %v2187_v11 = vadd.f32 %v2186_v9, %v2185_v7  ;;  %2343 = vmatprep.mubr.msk.bf16.mxu1 %vm1290_vm4, %v1265_v8  ;;  %v1245_v18 = vmax.f32 %v1185_v10, 0.0 }
 0x47d   :  { %v2188_v14 = vpop.f32.mrf.mxu0 }
 0x47e   :  { %v1188_v15 = vadd.f32 %v2187_v11, %v2877_v13 }
 0x47f   :  { %v2189_v17 = vpop.f32.mrf.mxu0 }
 0x480   :  { %v1246_v21 = vmax.f32 %v1188_v15, 0.0  ;;  %v2190_v22 = vadd.f32 %v2189_v17, %v2188_v14 }
 0x481   :  { %v2191_v23 = vpop.f32.mrf.mxu0 }
 0x482   :  { %v1266_v24 = vpack.c.bf16 %v1246_v21, %v1245_v18  ;;  %v1193_v26 = vadd.f32 %v2190_v22, %v2877_v13 }
 0x483   :  { %v2192_v25 = vpop.f32.mrf.mxu0 }
 0x484   :  { %v2193_v27 = vadd.f32 %v2192_v25, %v2191_v23  ;;  %2344 = vmatmul.mubr.msk.bf16.gmra.mxu1 %vm1290_vm4, %v1266_v24  ;;  %v1247_v33 = vmax.f32 %v1193_v26, 0.0 }
 0x485   :  { %v2194_v30 = vpop.f32.mrf.mxu0 }
 0x486   :  { %v1196_v31 = vadd.f32 %v2193_v27, %v2877_v13 }
 0x487   :  { %v2195_v32 = vpop.f32.mrf.mxu0 }
 0x488   :  { %v1248_v34 = vmax.f32 %v1196_v31, 0.0  ;;  %v2196_v35 = vadd.f32 %v2195_v32, %v2194_v30 }
 0x489   :  { %v2197_v36 = vpop.f32.mrf.mxu0 }
 0x48a   :  { %v1267_v38 = vpack.c.bf16 %v1248_v34, %v1247_v33  ;;  %v1201_v2 = vadd.f32 %v2196_v35, %v2877_v13 }
 0x48b   :  { %v2198_v0 = vpop.f32.mrf.mxu0 }
 0x48c   :  { %v2199_v28 = vadd.f32 %v2198_v0, %v2197_v36  ;;  %2347 = vmatprep.mubr.msk.bf16.mxu1 %vm1290_vm4, %v1267_v38  ;;  %v1249_v41 = vmax.f32 %v1201_v2, 0.0 }
 0x48d   :  { %v2200_v39 = vpop.f32.mrf.mxu0 }
 0x48e   :  { %v1204_v40 = vadd.f32 %v2199_v28, %v2877_v13 }
 0x48f   :  { %v2201_v19 = vpop.f32.mrf.mxu0 }
 0x490   :  { %v1250_v42 = vmax.f32 %v1204_v40, 0.0  ;;  %v2202_v47 = vadd.f32 %v2201_v19, %v2200_v39 }
 0x491   :  { %v2203_v48 = vpop.f32.mrf.mxu0 }
 0x492   :  { %v1268_v49 = vpack.c.bf16 %v1250_v42, %v1249_v41  ;;  %v1209_v51 = vadd.f32 %v2202_v47, %v2877_v13 }
 0x493   :  { %v2204_v50 = vpop.f32.mrf.mxu0 }
 0x494   :  { %v2205_v52 = vadd.f32 %v2204_v50, %v2203_v48  ;;  %2348 = vmatmul.mubr.msk.bf16.gmra.mxu1 %vm1290_vm4, %v1268_v49  ;;  %v1251_v56 = vmax.f32 %v1209_v51, 0.0 }
 0x495   :  { %v2206_v53 = vpop.f32.mrf.mxu0 }
 0x496   :  { %v1212_v54 = vadd.f32 %v2205_v52, %v2877_v13 }
 0x497   :  { %v2207_v55 = vpop.f32.mrf.mxu0 }
 0x498   :  { %v1252_v57 = vmax.f32 %v1212_v54, 0.0  ;;  %v2208_v58 = vadd.f32 %v2207_v55, %v2206_v53 }
 0x499   :  { %v2209_v59 = vpop.f32.mrf.mxu0 }
 0x49a   :  { %v1269_v60 = vpack.c.bf16 %v1252_v57, %v1251_v56  ;;  %v1217_v62 = vadd.f32 %v2208_v58, %v2877_v13 }
 0x49b   :  { %v2210_v61 = vpop.f32.mrf.mxu0 }
 0x49c   :  { %v2211_v63 = vadd.f32 %v2210_v61, %v2209_v59  ;;  %2351 = vmatprep.mubr.msk.bf16.mxu1 %vm1290_vm4, %v1269_v60  ;;  %v1253_v45 = vmax.f32 %v1217_v62, 0.0 }
 0x49e   :  { %v1220_v1 = vadd.f32 %v2211_v63, %v2877_v13 }
 0x4a0   :  { %v1254_v3 = vmax.f32 %v1220_v1, 0.0 }
 0x4a2   :  { %v1270_v4 = vpack.c.bf16 %v1254_v3, %v1253_v45 }
 0x4a4   :  { %2352 = vmatmul.mubr.msk.bf16.gmra.mxu1 %vm1290_vm4, %v1270_v4 }
 0x4f4   :  { %v2325_v29 = vpop.f32.mrf.mxu1 }
 0x4f5   :  { %v1386_v5 = vadd.f32 %v2325_v29, %v2933_v46 }
 0x4f6   :  { %v1377_v43 = vpop.f32.mrf.mxu1 }
 0x4f7   :  { %v1378_v37 = vadd.f32 %v2933_v46, %v1377_v43  ;;  %v1506_v10 = vmax.f32 %v1386_v5, 0.0 }
 0x4f8   :  { %v2326_v44 = vpop.f32.mrf.mxu1 }
 0x4f9   :  { %v1389_v20 = vadd.f32 %v2326_v44, %v2933_v46  ;;  %v1504_v8 = vmax.f32 %v1378_v37, 0.0 }
 0x4fa   :  { %v1380_v13 = vpop.f32.mrf.mxu1 }
 0x4fb   :  { %v1381_v6 = vadd.f32 %v2933_v46, %v1380_v13  ;;  %v1507_v7 = vmax.f32 %v1389_v20, 0.0 }
 0x4fd   :  { %v1505_v9 = vmax.f32 %v1381_v6, 0.0  ;;  %v1537_v12 = vpack.c.bf16 %v1507_v7, %v1506_v10 }
 0x4ff   :  { %v1536_v11 = vpack.c.bf16 %v1505_v9, %v1504_v8 }
 0x501   :  { %2357 = vmatprep.mubr.msk.bf16.mxu1 %vm1566_vm6, %v1536_v11 }
 0x502   :  { %2358 = vmatmul.mubr.msk.bf16.vlgmr.msra.gmra.mxu1 %vm1566_vm6, %v1537_v12 }
 0x504   :  { %v2329_v14 = vpop.f32.mrf.mxu1 }
 0x505   :  { %v1402_v21 = vadd.f32 %v2329_v14, %v2933_v46 }
 0x506   :  { %v1393_v15 = vpop.f32.mrf.mxu1 }
 0x507   :  { %v1394_v17 = vadd.f32 %v2933_v46, %v1393_v15  ;;  %v1510_v27 = vmax.f32 %v1402_v21, 0.0 }
 0x508   :  { %v2330_v16 = vpop.f32.mrf.mxu1 }
 0x509   :  { %v1405_v18 = vadd.f32 %v2330_v16, %v2933_v46  ;;  %v1508_v25 = vmax.f32 %v1394_v17, 0.0 }
 0x50a   :  { %v1396_v22 = vpop.f32.mrf.mxu1 }
 0x50b   :  { %v1397_v23 = vadd.f32 %v2933_v46, %v1396_v22  ;;  %v1511_v24 = vmax.f32 %v1405_v18, 0.0 }
 0x50d   :  { %v1509_v26 = vmax.f32 %v1397_v23, 0.0  ;;  %v1539_v31 = vpack.c.bf16 %v1511_v24, %v1510_v27 }
 0x50f   :  { %v1538_v30 = vpack.c.bf16 %v1509_v26, %v1508_v25 }
 0x511   :  { %2361 = vmatprep.mubr.msk.bf16.mxu1 %vm1566_vm6, %v1538_v30 }
 0x512   :  { %2362 = vmatmul.mubr.msk.bf16.gmra.mxu1 %vm1566_vm6, %v1539_v31 }
 0x514   :  { %v2333_v32 = vpop.f32.mrf.mxu1 }
 0x515   :  { %v1418_v38 = vadd.f32 %v2333_v32, %v2933_v46 }
 0x516   :  { %v1409_v33 = vpop.f32.mrf.mxu1 }
 0x517   :  { %v1410_v35 = vadd.f32 %v2933_v46, %v1409_v33  ;;  %v1514_v19 = vmax.f32 %v1418_v38, 0.0 }
 0x518   :  { %v2334_v34 = vpop.f32.mrf.mxu1 }
 0x519   :  { %v1421_v36 = vadd.f32 %v2334_v34, %v2933_v46  ;;  %v1512_v39 = vmax.f32 %v1410_v35, 0.0 }
 0x51a   :  { %v1412_v0 = vpop.f32.mrf.mxu1 }
 0x51b   :  { %v1413_v2 = vadd.f32 %v2933_v46, %v1412_v0  ;;  %v1515_v28 = vmax.f32 %v1421_v36, 0.0 }
 0x51d   :  { %v1513_v40 = vmax.f32 %v1413_v2, 0.0  ;;  %v1541_v42 = vpack.c.bf16 %v1515_v28, %v1514_v19 }
 0x51f   :  { %v1540_v41 = vpack.c.bf16 %v1513_v40, %v1512_v39 }
 0x521   :  { %2365 = vmatprep.mubr.msk.bf16.mxu1 %vm1566_vm6, %v1540_v41 }
 0x522   :  { %2366 = vmatmul.mubr.msk.bf16.gmra.mxu1 %vm1566_vm6, %v1541_v42 }
 0x524   :  { %v2337_v47 = vpop.f32.mrf.mxu1 }
 0x525   :  { %v1434_v52 = vadd.f32 %v2337_v47, %v2933_v46 }
 0x526   :  { %v1425_v48 = vpop.f32.mrf.mxu1 }
 0x527   :  { %v1426_v50 = vadd.f32 %v2933_v46, %v1425_v48  ;;  %v1518_v58 = vmax.f32 %v1434_v52, 0.0 }
 0x528   :  { %v2338_v49 = vpop.f32.mrf.mxu1 }
 0x529   :  { %v1437_v51 = vadd.f32 %v2338_v49, %v2933_v46  ;;  %v1516_v56 = vmax.f32 %v1426_v50, 0.0 }
 0x52a   :  { %v1428_v53 = vpop.f32.mrf.mxu1 }
 0x52b   :  { %v1429_v54 = vadd.f32 %v2933_v46, %v1428_v53  ;;  %v1519_v55 = vmax.f32 %v1437_v51, 0.0 }
 0x52d   :  { %v1517_v57 = vmax.f32 %v1429_v54, 0.0  ;;  %v1543_v60 = vpack.c.bf16 %v1519_v55, %v1518_v58  ;;  %v2986_v54 = vld [vmem:[%s3035_s9] ss:$0 sm:$0xff]  ;;  %s2530_s9 = smov [#allocation5]  }
 0x52e   :  { %s1817_s26 = sshll.u32 %s2530_s9, 4  ;;  %s1818_s26 = int_to_ptr.vmem [resolvable:$true] %s1817_s26 }
 0x52f   :  { %v1542_v59 = vpack.c.bf16 %v1517_v57, %v1516_v56  ;;  %s2503_s27 = scalar_lea.vmem %s1818_s26, 4096  ;;  %p2508_p6 = scmp.lt.s32.totalorder %s1818_s26, %s1818_s26 }
 0x530   :  { %p2504_p5 = scmp.ne.s32.totalorder %s1818_s26, %s2503_s27  ;;  %p2509_p7 = scmp.lt.s32.totalorder %s2503_s27, %s2503_s27 }
 0x531   :  { %2369 = vmatprep.mubr.msk.bf16.mxu1 %vm1566_vm6, %v1542_v59 }
 0x532   :  { %2370 = vmatmul.mubr.msk.bf16.gmra.mxu1 %vm1566_vm6, %v1543_v60  ;;  %p2510_p8 = por %p2509_p7, %p2508_p6 }
 0x534   :  { %v2341_v61 = vpop.f32.mrf.mxu1  ;;  %p2511_p9 = pnand %p2510_p8, %p2504_p5 }
 0x535   :  { %v1450_v3 = vadd.f32 %v2341_v61, %v2933_v46 }
 0x536   :  { %v1441_v62 = vpop.f32.mrf.mxu1 }
 0x537   :  { %v1442_v1 = vadd.f32 %v2933_v46, %v1441_v62  ;;  %v1522_v20 = vmax.f32 %v1450_v3, 0.0 }
 0x538   :  { %v2342_v63 = vpop.f32.mrf.mxu1 }
 0x539   :  { %v1453_v45 = vadd.f32 %v2342_v63, %v2933_v46  ;;  %v1520_v44 = vmax.f32 %v1442_v1, 0.0 }
 0x53a   :  { %v1444_v4 = vpop.f32.mrf.mxu1 }
 0x53b   :  { %v1445_v29 = vadd.f32 %v2933_v46, %v1444_v4  ;;  %v1523_v43 = vmax.f32 %v1453_v45, 0.0 }
 0x53d   :  { %v1521_v37 = vmax.f32 %v1445_v29, 0.0  ;;  %v1545_v13 = vpack.c.bf16 %v1523_v43, %v1522_v20 }
 0x53f   :  { %v1544_v5 = vpack.c.bf16 %v1521_v37, %v1520_v44 }
 0x541   :  { %2373 = vmatprep.mubr.msk.bf16.mxu1 %vm1566_vm6, %v1544_v5 }
 0x542   :  { %2374 = vmatmul.mubr.msk.bf16.gmra.mxu1 %vm1566_vm6, %v1545_v13 }
 0x544   :  { %v2345_v6 = vpop.f32.mrf.mxu1 }
 0x545   :  { %v1466_v11 = vadd.f32 %v2345_v6, %v2933_v46 }
 0x546   :  { %v1457_v7 = vpop.f32.mrf.mxu1 }
 0x547   :  { %v1458_v9 = vadd.f32 %v2933_v46, %v1457_v7  ;;  %v1526_v18 = vmax.f32 %v1466_v11, 0.0 }
 0x548   :  { %v2346_v8 = vpop.f32.mrf.mxu1 }
 0x549   :  { %v1469_v10 = vadd.f32 %v2346_v8, %v2933_v46  ;;  %v1524_v16 = vmax.f32 %v1458_v9, 0.0 }
 0x54a   :  { %v1460_v12 = vpop.f32.mrf.mxu1 }
 0x54b   :  { %v1461_v14 = vadd.f32 %v2933_v46, %v1460_v12  ;;  %v1527_v15 = vmax.f32 %v1469_v10, 0.0 }
 0x54d   :  { %v1525_v17 = vmax.f32 %v1461_v14, 0.0  ;;  %v1547_v22 = vpack.c.bf16 %v1527_v15, %v1526_v18 }
 0x54f   :  { %v1546_v21 = vpack.c.bf16 %v1525_v17, %v1524_v16 }
 0x551   :  { %2377 = vmatprep.mubr.msk.bf16.mxu1 %vm1566_vm6, %v1546_v21 }
 0x552   :  { %2378 = vmatmul.mubr.msk.bf16.gmra.mxu1 %vm1566_vm6, %v1547_v22 }
 0x554   :  { %v2349_v23 = vpop.f32.mrf.mxu1 }
 0x555   :  { %v1482_v30 = vadd.f32 %v2349_v23, %v2933_v46 }
 0x556   :  { %v1473_v24 = vpop.f32.mrf.mxu1 }
 0x557   :  { %v1474_v26 = vadd.f32 %v2933_v46, %v1473_v24  ;;  %v1530_v36 = vmax.f32 %v1482_v30, 0.0 }
 0x558   :  { %v2350_v25 = vpop.f32.mrf.mxu1 }
 0x559   :  { %v1485_v27 = vadd.f32 %v2350_v25, %v2933_v46  ;;  %v1528_v34 = vmax.f32 %v1474_v26, 0.0 }
 0x55a   :  { %v1476_v31 = vpop.f32.mrf.mxu1 }
 0x55b   :  { %v1477_v32 = vadd.f32 %v2933_v46, %v1476_v31  ;;  %v1531_v33 = vmax.f32 %v1485_v27, 0.0 }
 0x55d   :  { %v1529_v35 = vmax.f32 %v1477_v32, 0.0  ;;  %v1549_v0 = vpack.c.bf16 %v1531_v33, %v1530_v36 }
 0x55f   :  { %v1548_v38 = vpack.c.bf16 %v1529_v35, %v1528_v34 }
 0x561   :  { %2381 = vmatprep.mubr.msk.bf16.mxu1 %vm1566_vm6, %v1548_v38 }
 0x562   :  { %2382 = vmatmul.mubr.msk.bf16.gmra.mxu1 %vm1566_vm6, %v1549_v0 }
 0x564   :  { %v2353_v2 = vpop.f32.mrf.mxu1 }
 0x565   :  { %v1498_v41 = vadd.f32 %v2353_v2, %v2933_v46 }
 0x566   :  { %v1489_v28 = vpop.f32.mrf.mxu1 }
 0x567   :  { %v1490_v40 = vadd.f32 %v2933_v46, %v1489_v28  ;;  %v1534_v51 = vmax.f32 %v1498_v41, 0.0 }
 0x568   :  { %v2354_v39 = vpop.f32.mrf.mxu1 }
 0x569   :  { %v1501_v19 = vadd.f32 %v2354_v39, %v2933_v46  ;;  %v1532_v49 = vmax.f32 %v1490_v40, 0.0 }
 0x56a   :  { %v1492_v42 = vpop.f32.mrf.mxu1 }
 0x56b   :  { %v1493_v47 = vadd.f32 %v2933_v46, %v1492_v42  ;;  %v1535_v48 = vmax.f32 %v1501_v19, 0.0 }
 0x56d   :  { %v1533_v50 = vmax.f32 %v1493_v47, 0.0  ;;  %v1551_v53 = vpack.c.bf16 %v1535_v48, %v1534_v51 }
 0x56f   :  { %v1550_v52 = vpack.c.bf16 %v1533_v50, %v1532_v49 }
 0x571   :  { %2385 = vmatprep.mubr.msk.bf16.mxu1 %vm1566_vm6, %v1550_v52 }
 0x572   :  { %2386 = vmatmul.mubr.msk.bf16.gmra.mxu1 %vm1566_vm6, %v1551_v53 }
 0x5c2   :  { %v2359_v55 = vpop.f32.mrf.mxu1 }
 0x5c3   :  { %v1662_v56 = vadd.f32 %v2359_v55, %v2986_v54 }
 0x5c4   :  { %v1653_v57 = vpop.f32.mrf.mxu1 }
 0x5c5   :  { %1782 = vst [vmem:[#allocation5 + $0x10] sm:$0xff] %v1662_v56  ;;  %v1654_v46 = vadd.f32 %v2986_v54, %v1653_v57 }
 0x5c6   :  { %v2360_v58 = vpop.f32.mrf.mxu1 }
 0x5c7   :  { %1780 = vst [vmem:[#allocation5] sm:$0xff] %v1654_v46  ;;  %v1665_v59 = vadd.f32 %v2360_v58, %v2986_v54 }
 0x5c8   :  { %v1656_v60 = vpop.f32.mrf.mxu1 }
 0x5c9   :  { %1783 = vst [vmem:[#allocation5 + $0x18] sm:$0xff] %v1665_v59  ;;  %v1657_v61 = vadd.f32 %v2986_v54, %v1656_v60 }
 0x5cb   :  { %1781 = vst [vmem:[#allocation5 + $0x8] sm:$0xff] %v1657_v61 }
 0x5d2   :  { %v2363_v62 = vpop.f32.mrf.mxu1 }
 0x5d3   :  { %v1678_v63 = vadd.f32 %v2363_v62, %v2986_v54 }
 0x5d4   :  { %v1669_v1 = vpop.f32.mrf.mxu1 }
 0x5d5   :  { %1786 = vst [vmem:[#allocation5 + $0x30] sm:$0xff] %v1678_v63  ;;  %v1670_v45 = vadd.f32 %v2986_v54, %v1669_v1 }
 0x5d6   :  { %v2364_v3 = vpop.f32.mrf.mxu1 }
 0x5d7   :  { %1784 = vst [vmem:[#allocation5 + $0x20] sm:$0xff] %v1670_v45  ;;  %v1681_v4 = vadd.f32 %v2364_v3, %v2986_v54 }
 0x5d8   :  { %v1672_v29 = vpop.f32.mrf.mxu1 }
 0x5d9   :  { %1787 = vst [vmem:[#allocation5 + $0x38] sm:$0xff] %v1681_v4  ;;  %v1673_v43 = vadd.f32 %v2986_v54, %v1672_v29 }
 0x5db   :  { %1785 = vst [vmem:[#allocation5 + $0x28] sm:$0xff] %v1673_v43 }
 0x5e2   :  { %v2367_v44 = vpop.f32.mrf.mxu1 }
 0x5e3   :  { %v1694_v37 = vadd.f32 %v2367_v44, %v2986_v54 }
 0x5e4   :  { %v1685_v20 = vpop.f32.mrf.mxu1 }
 0x5e5   :  { %1790 = vst [vmem:[#allocation5 + $0x50] sm:$0xff] %v1694_v37  ;;  %v1686_v5 = vadd.f32 %v2986_v54, %v1685_v20 }
 0x5e6   :  { %v2368_v13 = vpop.f32.mrf.mxu1 }
 0x5e7   :  { %1788 = vst [vmem:[#allocation5 + $0x40] sm:$0xff] %v1686_v5  ;;  %v1697_v6 = vadd.f32 %v2368_v13, %v2986_v54 }
 0x5e8   :  { %v1688_v7 = vpop.f32.mrf.mxu1 }
 0x5e9   :  { %1791 = vst [vmem:[#allocation5 + $0x58] sm:$0xff] %v1697_v6  ;;  %v1689_v8 = vadd.f32 %v2986_v54, %v1688_v7 }
 0x5eb   :  { %1789 = vst [vmem:[#allocation5 + $0x48] sm:$0xff] %v1689_v8 }
 0x5f2   :  { %v2371_v9 = vpop.f32.mrf.mxu1 }
 0x5f3   :  { %v1710_v10 = vadd.f32 %v2371_v9, %v2986_v54 }
 0x5f4   :  { %v1701_v11 = vpop.f32.mrf.mxu1 }
 0x5f5   :  { %1794 = vst [vmem:[#allocation5 + $0x70] sm:$0xff] %v1710_v10  ;;  %v1702_v12 = vadd.f32 %v2986_v54, %v1701_v11 }
 0x5f6   :  { %v2372_v14 = vpop.f32.mrf.mxu1 }
 0x5f7   :  { %1792 = vst [vmem:[#allocation5 + $0x60] sm:$0xff] %v1702_v12  ;;  %v1713_v15 = vadd.f32 %v2372_v14, %v2986_v54 }
 0x5f8   :  { %v1704_v16 = vpop.f32.mrf.mxu1 }
 0x5f9   :  { %1795 = vst [vmem:[#allocation5 + $0x78] sm:$0xff] %v1713_v15  ;;  %v1705_v17 = vadd.f32 %v2986_v54, %v1704_v16 }
 0x5fb   :  { %1793 = vst [vmem:[#allocation5 + $0x68] sm:$0xff] %v1705_v17 }
 0x602   :  { %v2375_v18 = vpop.f32.mrf.mxu1 }
 0x603   :  { %v1726_v21 = vadd.f32 %v2375_v18, %v2986_v54 }
 0x604   :  { %v1717_v22 = vpop.f32.mrf.mxu1 }
 0x605   :  { %1798 = vst [vmem:[#allocation5 + $0x90] sm:$0xff] %v1726_v21  ;;  %v1718_v23 = vadd.f32 %v2986_v54, %v1717_v22 }
 0x606   :  { %v2376_v24 = vpop.f32.mrf.mxu1 }
 0x607   :  { %1796 = vst [vmem:[#allocation5 + $0x80] sm:$0xff] %v1718_v23  ;;  %v1729_v25 = vadd.f32 %v2376_v24, %v2986_v54 }
 0x608   :  { %v1720_v26 = vpop.f32.mrf.mxu1 }
 0x609   :  { %1799 = vst [vmem:[#allocation5 + $0x98] sm:$0xff] %v1729_v25  ;;  %v1721_v27 = vadd.f32 %v2986_v54, %v1720_v26 }
 0x60b   :  { %1797 = vst [vmem:[#allocation5 + $0x88] sm:$0xff] %v1721_v27 }
 0x612   :  { %v2379_v30 = vpop.f32.mrf.mxu1 }
 0x613   :  { %v1742_v31 = vadd.f32 %v2379_v30, %v2986_v54 }
 0x614   :  { %v1733_v32 = vpop.f32.mrf.mxu1 }
 0x615   :  { %1802 = vst [vmem:[#allocation5 + $0xb0] sm:$0xff] %v1742_v31  ;;  %v1734_v33 = vadd.f32 %v2986_v54, %v1733_v32 }
 0x616   :  { %v2380_v34 = vpop.f32.mrf.mxu1 }
 0x617   :  { %1800 = vst [vmem:[#allocation5 + $0xa0] sm:$0xff] %v1734_v33  ;;  %v1745_v35 = vadd.f32 %v2380_v34, %v2986_v54 }
 0x618   :  { %v1736_v36 = vpop.f32.mrf.mxu1 }
 0x619   :  { %1803 = vst [vmem:[#allocation5 + $0xb8] sm:$0xff] %v1745_v35  ;;  %v1737_v38 = vadd.f32 %v2986_v54, %v1736_v36 }
 0x61b   :  { %1801 = vst [vmem:[#allocation5 + $0xa8] sm:$0xff] %v1737_v38 }
 0x622   :  { %v2383_v0 = vpop.f32.mrf.mxu1 }
 0x623   :  { %v1758_v2 = vadd.f32 %v2383_v0, %v2986_v54 }
 0x624   :  { %v1749_v28 = vpop.f32.mrf.mxu1 }
 0x625   :  { %1806 = vst [vmem:[#allocation5 + $0xd0] sm:$0xff] %v1758_v2  ;;  %v1750_v39 = vadd.f32 %v2986_v54, %v1749_v28 }
 0x626   :  { %v2384_v40 = vpop.f32.mrf.mxu1 }
 0x627   :  { %1804 = vst [vmem:[#allocation5 + $0xc0] sm:$0xff] %v1750_v39  ;;  %v1761_v19 = vadd.f32 %v2384_v40, %v2986_v54 }
 0x628   :  { %v1752_v41 = vpop.f32.mrf.mxu1 }
 0x629   :  { %1807 = vst [vmem:[#allocation5 + $0xd8] sm:$0xff] %v1761_v19  ;;  %v1753_v42 = vadd.f32 %v2986_v54, %v1752_v41 }
 0x62b   :  { %1805 = vst [vmem:[#allocation5 + $0xc8] sm:$0xff] %v1753_v42 }
 0x632   :  { %v2387_v47 = vpop.f32.mrf.mxu1 }
 0x633   :  { %v1774_v48 = vadd.f32 %v2387_v47, %v2986_v54 }
 0x634   :  { %v1765_v49 = vpop.f32.mrf.mxu1 }
 0x635   :  { %1810 = vst [vmem:[#allocation5 + $0xf0] sm:$0xff] %v1774_v48  ;;  %v1766_v50 = vadd.f32 %v2986_v54, %v1765_v49 }
 0x636   :  { %v2388_v51 = vpop.f32.mrf.mxu1 }
 0x637   :  { %1808 = vst [vmem:[#allocation5 + $0xe0] sm:$0xff] %v1766_v50  ;;  %v1777_v52 = vadd.f32 %v2388_v51, %v2986_v54 }
 0x638   :  { %v1768_v53 = vpop.f32.mrf.mxu1 }
 0x639   :  { %1811 = vst [vmem:[#allocation5 + $0xf8] sm:$0xff] %v1777_v52  ;;  %v1769_v55 = vadd.f32 %v2986_v54, %v1768_v53 }
 0x63b   :  { %1809 = vst [vmem:[#allocation5 + $0xe8] sm:$0xff] %v1769_v55 }
 0x63c   :  { %2514 = shalt.err (!%p2511_p9)
}
 0x63d   :  { %1823 = dma.vmem_to_hbm [thread:$0]  %s1818_s26, 4096, %s3036_s10, [#allocation4], %s2528_s16, %s2528_s16, %s2529_s17  }
 0x63e   :  { %2525 = dma.done.wait [#allocation4], 4096  }
 0x63f   :  { %2526 = vsyncadd [#allocation4], 4294963200 }
 0x640   :  { %1827 = vsyncpa [#allocation3], 1 }
 0x641   :  { %1828 = vsyncpa [#allocation4], 1 }

</bundles_post_ra>
